<compile_context>
chip_gen: v7x
topology: tpu7x:2x2x1
jax: 0.10.0
libtpu: 0.0.40
codegen_flags: <defaults>
</compile_context>

<pallas_src>
import math
import numpy as np
import jax
import jax.numpy as jnp
from jax.experimental import pallas as pl
from jax.experimental.pallas import tpu as pltpu

# ----------------------------- model config --------------------------------
VOCAB    = 64
SEQ      = 8                      # power of two -> cheap shift/and index math
D_MODEL  = 32
N_LAYERS = 2
N_HEADS  = 4
D_K      = D_MODEL // N_HEADS
D_FF     = 64
PAD_ID   = 0
BATCH    = 2
N_TOK    = BATCH * SEQ
SMALL_W  = 3 * D_MODEL            # width of packed small-parameter rows (96)
EP_ROWS  = VOCAB + SEQ + 1        # concatenated [embedding ; sinusoid] table
V_PAD    = 128                    # LM-head vocab padded to one full lane width
assert SEQ & (SEQ - 1) == 0
# NOTE: dropout layers are identity in eval mode; p_drop is irrelevant here.
# TODO(synk): LMTrm.__init__ references self.n_directions / self.dim_hidden /
# self.vocab_size (undefined in the PyTorch source); we take dim_hidden == d_model.


# ------------------------------ kernel --------------------------------------
def _layernorm(x, g, b, eps=1e-6):
    mu = jnp.mean(x, axis=-1, keepdims=True)
    var = jnp.mean((x - mu) ** 2, axis=-1, keepdims=True)
    return (x - mu) * jax.lax.rsqrt(var + eps) * g + b


def fused_forward_kernel(ids_col_ref, ids_row_ref, ep_ref,
                         wqkv_ref, wo_ref, w1_ref, w2_ref, small_ref,
                         head_ref, out_ref):
    """Entire LMTrm forward for all B*S token rows in one kernel invocation."""
    f32, bf16 = jnp.float32, jnp.bfloat16
    N = N_TOK

    tok_col = ids_col_ref[...]                              # (N, 1) int32
    tok_row = ids_row_ref[...]                              # (1, N) int32

    # ---- embedding + positional lookup: ONE one-hot matmul (exact in f32) --
    # columns [0, VOCAB) select the token embedding row, columns
    # [VOCAB, VOCAB+SEQ] select the sinusoid row; both hits sum in f32,
    # reproducing nn.Embedding(tok) + pos_embedding(pos) exactly.
    lane = jax.lax.broadcasted_iota(jnp.int32, (N, EP_ROWS), 1)
    pos_base = jnp.bitwise_and(
        jax.lax.broadcasted_iota(jnp.int32, (N, 1), 0), SEQ - 1) + 1
    pos_idx = jnp.where(tok_col == PAD_ID, 0, pos_base)     # (N, 1)
    one_hot = jnp.logical_or(lane == tok_col,
                             lane == (VOCAB + pos_idx)).astype(f32)
    x = jnp.dot(one_hot, ep_ref[...], preferred_element_type=f32)  # (N, D) f32

    # ---- attention mask (built in-kernel): key-is-PAD OR different batch ---
    shift = int(math.log2(SEQ))
    qi = jax.lax.broadcasted_iota(jnp.int32, (N, N), 0)
    ki = jax.lax.broadcasted_iota(jnp.int32, (N, N), 1)
    cross_batch = (qi >> shift) != (ki >> shift)            # block-diag batches
    mask = jnp.logical_or(cross_batch, tok_row == PAD_ID)   # (N, N) bool

    scale = 1.0 / math.sqrt(D_K)
    for l in range(N_LAYERS):                               # static unroll
        wqkv = wqkv_ref[l]                                  # (D, 3D)   bf16
        wo   = wo_ref[l]                                    # (D, D)    bf16
        w1   = w1_ref[l]                                    # (D, D_FF) bf16
        w2   = w2_ref[l]                                    # (D_FF, D) bf16
        sm   = small_ref[l]                                 # (8, 96)   f32
        b_qkv = sm[0:1, :]
        bo    = sm[1:2, :D_MODEL]
        ln1g  = sm[2:3, :D_MODEL]
        ln1b  = sm[3:4, :D_MODEL]
        b1    = sm[4:5, :D_FF]
        b2    = sm[5:6, :D_MODEL]
        ln2g  = sm[6:7, :D_MODEL]
        ln2b  = sm[7:8, :D_MODEL]

        # fused Q/K/V projection: one matmul (bf16 in, f32 accumulate)
        qkv = jnp.dot(x.astype(bf16), wqkv,
                      preferred_element_type=f32) + b_qkv   # (N, 3D) f32

        # head-batched tensors (H, N, D_K)
        qh = jnp.stack([qkv[:, h * D_K:(h + 1) * D_K]
                        for h in range(N_HEADS)], axis=0)
        kh = jnp.stack([qkv[:, D_MODEL + h * D_K:D_MODEL + (h + 1) * D_K]
                        for h in range(N_HEADS)], axis=0)
        vh = jnp.stack([qkv[:, 2 * D_MODEL + h * D_K:2 * D_MODEL + (h + 1) * D_K]
                        for h in range(N_HEADS)], axis=0)

        # one batched score einsum + one softmax chain for all heads/batches
        s = jnp.einsum('hqd,hkd->hqk', qh.astype(bf16), kh.astype(bf16),
                       preferred_element_type=f32) * scale  # (H, N, N) f32
        s = jnp.where(mask[None, :, :], -1e9, s)
        s = s - jnp.max(s, axis=-1, keepdims=True)
        p = jnp.exp(s)
        p = p * pl.reciprocal(jnp.sum(p, axis=-1, keepdims=True), approx=True)
        ctx = jnp.einsum('hqk,hkd->hqd', p.astype(bf16), vh.astype(bf16),
                         preferred_element_type=f32)        # (H, N, D_K)

        attn = jnp.concatenate([ctx[h] for h in range(N_HEADS)], axis=-1)
        attn = jnp.dot(attn.astype(bf16), wo,
                       preferred_element_type=f32) + bo     # (N, D)

        h1 = _layernorm(x + attn, ln1g, ln1b)               # f32

        f = jnp.dot(h1.astype(bf16), w1, preferred_element_type=f32) + b1
        f = jnp.maximum(f, 0.0)
        f = jnp.dot(f.astype(bf16), w2, preferred_element_type=f32) + b2

        x = _layernorm(h1 + f, ln2g, ln2b)                  # (N, D)

    # ---- LM head (vocab padded to 128 lanes -> unmasked single-slab store) --
    w_out = head_ref[:D_MODEL, :].astype(bf16)              # (D, V_PAD)
    b_out = head_ref[D_MODEL:D_MODEL + 1, :]                # (1, V_PAD) f32
    logits = jnp.dot(x.astype(bf16), w_out,
                     preferred_element_type=f32) + b_out    # (N, V_PAD)
    out_ref[...] = logits


# ------------------------------ wrapper --------------------------------------
def lm_trm_forward(tokens, params):
    B, S = tokens.shape
    N = B * S
    ids_col = tokens.reshape(N, 1).astype(jnp.int32)
    ids_row = tokens.reshape(1, N).astype(jnp.int32)

    def full(shape):
        nd = len(shape)
        return pl.BlockSpec(shape, lambda i, _nd=nd: (0,) * _nd)

    operands = (ids_col, ids_row, params["ep"], params["wqkv"], params["wo"],
                params["w1"], params["w2"], params["small"], params["head"])
    logits_pad = pl.pallas_call(
        fused_forward_kernel,
        out_shape=jax.ShapeDtypeStruct((N, V_PAD), jnp.float32),
        grid=(1,),
        in_specs=[full(op.shape) for op in operands],
        out_specs=pl.BlockSpec((N, V_PAD), lambda i: (0, 0)),
        compiler_params=pltpu.CompilerParams(
            dimension_semantics=("arbitrary",)),
    )(*operands)
    # drop the lane padding and restore (B, S, V); trivial 4 KiB slice.
    return logits_pad[:, :VOCAB].reshape(B, S, VOCAB)


# --------------------------- parameter building ------------------------------
def sinusoid_table(seq_len, d_model):
    def get_angle(pos, i):
        return pos / np.power(10000, 2 * (i // 2) / d_model)
    tbl = np.zeros((seq_len, d_model), dtype=np.float32)
    for pos in range(seq_len):
        for i in range(d_model):
            a = get_angle(pos, i)
            tbl[pos, i] = np.sin(a) if i % 2 == 0 else np.cos(a)
    return jnp.asarray(tbl)


def init_params(key):
    ks = jax.random.split(key, 64)
    ki = iter(range(64))

    def lin(in_d, out_d):
        w = jax.random.normal(ks[next(ki)], (in_d, out_d), jnp.float32) * 0.05
        b = jax.random.normal(ks[next(ki)], (1, out_d), jnp.float32) * 0.01
        return w, b

    def pad_row(v):
        v = jnp.reshape(v, (-1,)).astype(jnp.float32)
        return jnp.concatenate(
            [v, jnp.zeros((SMALL_W - v.shape[0],), jnp.float32)])

    emb = jax.random.normal(ks[next(ki)], (VOCAB, D_MODEL), jnp.float32) * 0.1
    pos = sinusoid_table(SEQ + 1, D_MODEL)
    ep = jnp.concatenate([emb, pos], axis=0)                 # (VOCAB+SEQ+1, D)

    wqkv_l, wo_l, w1_l, w2_l, small_l = [], [], [], [], []
    for _ in range(N_LAYERS):
        wq, bq = lin(D_MODEL, D_MODEL)
        wk, bk = lin(D_MODEL, D_MODEL)
        wv, bv = lin(D_MODEL, D_MODEL)
        wo, bo = lin(D_MODEL, D_MODEL)
        w1, b1 = lin(D_MODEL, D_FF)
        w2, b2 = lin(D_FF, D_MODEL)
        ln1g = jnp.ones((D_MODEL,), jnp.float32)
        ln1b = jnp.zeros((D_MODEL,), jnp.float32)
        ln2g = jnp.ones((D_MODEL,), jnp.float32)
        ln2b = jnp.zeros((D_MODEL,), jnp.float32)

        wqkv_l.append(jnp.concatenate([wq, wk, wv], axis=1))  # (D, 3D)
        wo_l.append(wo)
        w1_l.append(w1)
        w2_l.append(w2)
        small_l.append(jnp.stack([
            pad_row(jnp.concatenate([bq, bk, bv], axis=1)),   # row 0: b_qkv
            pad_row(bo), pad_row(ln1g), pad_row(ln1b),
            pad_row(b1), pad_row(b2), pad_row(ln2g), pad_row(ln2b),
        ]))                                                   # (8, 96)

    # LM head, zero-padded to 128 lanes for an unmasked output store.
    w_out, b_out = lin(D_MODEL, VOCAB)
    w_out_p = jnp.zeros((D_MODEL, V_PAD), jnp.float32).at[:, :VOCAB].set(w_out)
    b_out_p = jnp.zeros((1, V_PAD), jnp.float32).at[:, :VOCAB].set(b_out)
    head = jnp.concatenate([w_out_p, b_out_p], axis=0)        # (D+1, V_PAD)

    return dict(
        ep=ep,                                                # f32 (exact gather)
        wqkv=jnp.stack(wqkv_l).astype(jnp.bfloat16),          # (L, D, 3D)
        wo=jnp.stack(wo_l).astype(jnp.bfloat16),              # (L, D, D)
        w1=jnp.stack(w1_l).astype(jnp.bfloat16),              # (L, D, D_FF)
        w2=jnp.stack(w2_l).astype(jnp.bfloat16),              # (L, D_FF, D)
        small=jnp.stack(small_l),                             # (L, 8, 96) f32
        head=head,                                            # (D+1, 128) f32
    )


# ------------------------------- main ----------------------------------------
if __name__ == "__main__":
    key = jax.random.PRNGKey(0)
    k_tok, k_par = jax.random.split(key)

    tokens = jax.random.randint(k_tok, (BATCH, SEQ), 1, VOCAB, dtype=jnp.int32)
    tokens = tokens.at[0, -2:].set(PAD_ID)   # padding to exercise the mask

    params = init_params(k_par)

    fwd = jax.jit(lm_trm_forward)
    logits = fwd(tokens, params)
    jax.block_until_ready(logits)

    assert logits.shape == (BATCH, SEQ, VOCAB)
    assert jnp.all(jnp.isfinite(logits))
    print("KERNEL_OK")
</pallas_src>

<mosaic_0001>
module attributes {stable_mosaic.version = 11 : i64} {
  func.func @fused_forward_kernel(%arg0: i32, %arg1: memref<16x1xi32, #tpu.memory_space<vmem>>, %arg2: memref<1x16xi32, #tpu.memory_space<vmem>>, %arg3: memref<73x32xf32, #tpu.memory_space<vmem>>, %arg4: memref<2x32x96xbf16, #tpu.memory_space<vmem>>, %arg5: memref<2x32x32xbf16, #tpu.memory_space<vmem>>, %arg6: memref<2x32x64xbf16, #tpu.memory_space<vmem>>, %arg7: memref<2x64x32xbf16, #tpu.memory_space<vmem>>, %arg8: memref<2x8x96xf32, #tpu.memory_space<vmem>>, %arg9: memref<33x128xf32, #tpu.memory_space<vmem>>, %arg10: memref<16x128xf32, #tpu.memory_space<vmem>>) attributes {dimension_semantics = [#tpu.dimension_semantics<arbitrary>], iteration_bounds = array<i64: 1>, scalar_prefetch = 0 : i64, scratch_operands = 0 : i64, tpu.core_type = #tpu.core_type<tc>, window_params = [{pipeline_mode = #tpu.pipeline_mode<synchronous>, transform_indices = @transform_0, window_bounds = array<i64: 16, 1>}, {pipeline_mode = #tpu.pipeline_mode<synchronous>, transform_indices = @transform_1, window_bounds = array<i64: 1, 16>}, {pipeline_mode = #tpu.pipeline_mode<synchronous>, transform_indices = @transform_2, window_bounds = array<i64: 73, 32>}, {pipeline_mode = #tpu.pipeline_mode<synchronous>, transform_indices = @transform_3, window_bounds = array<i64: 2, 32, 96>}, {pipeline_mode = #tpu.pipeline_mode<synchronous>, transform_indices = @transform_4, window_bounds = array<i64: 2, 32, 32>}, {pipeline_mode = #tpu.pipeline_mode<synchronous>, transform_indices = @transform_5, window_bounds = array<i64: 2, 32, 64>}, {pipeline_mode = #tpu.pipeline_mode<synchronous>, transform_indices = @transform_6, window_bounds = array<i64: 2, 64, 32>}, {pipeline_mode = #tpu.pipeline_mode<synchronous>, transform_indices = @transform_7, window_bounds = array<i64: 2, 8, 96>}, {pipeline_mode = #tpu.pipeline_mode<synchronous>, transform_indices = @transform_8, window_bounds = array<i64: 33, 128>}, {pipeline_mode = #tpu.pipeline_mode<synchronous>, transform_indices = @transform_9, window_bounds = array<i64: 16, 128>}]} {
    %c0 = arith.constant 0 : index
    %c0_0 = arith.constant 0 : index
    %0 = vector.load %arg1[%c0, %c0_0] : memref<16x1xi32, #tpu.memory_space<vmem>>, vector<16x1xi32>
    %c0_1 = arith.constant 0 : index
    %c0_2 = arith.constant 0 : index
    %1 = vector.load %arg2[%c0_1, %c0_2] : memref<1x16xi32, #tpu.memory_space<vmem>>, vector<1x16xi32>
    %2 = tpu.iota {dimensions = array<i32: 1>} : vector<16x73xi32>
    %3 = tpu.iota {dimensions = array<i32: 0>} : vector<16x1xi32>
    %c7_i32 = arith.constant 7 : i32
    %4 = vector.broadcast %c7_i32 : i32 to vector<16x1xi32>
    %5 = arith.andi %3, %4 : vector<16x1xi32>
    %c1_i32 = arith.constant 1 : i32
    %6 = vector.broadcast %c1_i32 : i32 to vector<16x1xi32>
    %7 = arith.addi %5, %6 : vector<16x1xi32>
    %c0_i32 = arith.constant 0 : i32
    %8 = vector.broadcast %c0_i32 : i32 to vector<16x1xi32>
    %9 = arith.cmpi eq, %0, %8 : vector<16x1xi32>
    %c0_i32_3 = arith.constant 0 : i32
    %10 = vector.broadcast %c0_i32_3 : i32 to vector<16x1xi32>
    %11 = arith.select %9, %10, %7 : vector<16x1xi1>, vector<16x1xi32>
    %12 = vector.broadcast %0 : vector<16x1xi32> to vector<16x73xi32>
    %13 = arith.cmpi eq, %2, %12 : vector<16x73xi32>
    %c64_i32 = arith.constant 64 : i32
    %14 = vector.broadcast %c64_i32 : i32 to vector<16x1xi32>
    %15 = arith.addi %14, %11 : vector<16x1xi32>
    %16 = vector.broadcast %15 : vector<16x1xi32> to vector<16x73xi32>
    %17 = arith.cmpi eq, %2, %16 : vector<16x73xi32>
    %18 = arith.ori %13, %17 : vector<16x73xi1>
    %19 = arith.extui %18 : vector<16x73xi1> to vector<16x73xi32>
    %20 = arith.sitofp %19 : vector<16x73xi32> to vector<16x73xf32>
    %c0_4 = arith.constant 0 : index
    %c0_5 = arith.constant 0 : index
    %21 = vector.load %arg3[%c0_4, %c0_5] : memref<73x32xf32, #tpu.memory_space<vmem>>, vector<73x32xf32>
    %cst = arith.constant dense<0.000000e+00> : vector<16x32xf32>
    %22 = tpu.matmul %20, %21, %cst {dimension_numbers = #tpu.dot_dimension_numbers<[1], [0], [0], [1], [0, 0, 1, 1], [], []>} : vector<16x73xf32>, vector<73x32xf32>, vector<16x32xf32> -> vector<16x32xf32>
    %23 = tpu.iota {dimensions = array<i32: 0>} : vector<16x16xi32>
    %24 = tpu.iota {dimensions = array<i32: 1>} : vector<16x16xi32>
    %c3_i32 = arith.constant 3 : i32
    %25 = vector.broadcast %c3_i32 : i32 to vector<16x16xi32>
    %26 = arith.shrsi %23, %25 : vector<16x16xi32>
    %c3_i32_6 = arith.constant 3 : i32
    %27 = vector.broadcast %c3_i32_6 : i32 to vector<16x16xi32>
    %28 = arith.shrsi %24, %27 : vector<16x16xi32>
    %29 = arith.cmpi ne, %26, %28 : vector<16x16xi32>
    %c0_i32_7 = arith.constant 0 : i32
    %30 = vector.broadcast %c0_i32_7 : i32 to vector<1x16xi32>
    %31 = arith.cmpi eq, %1, %30 : vector<1x16xi32>
    %32 = vector.broadcast %31 : vector<1x16xi1> to vector<16x16xi1>
    %33 = arith.ori %29, %32 : vector<16x16xi1>
    %c0_8 = arith.constant 0 : index
    %c0_9 = arith.constant 0 : index
    %c0_10 = arith.constant 0 : index
    %34 = vector.load %arg4[%c0_8, %c0_9, %c0_10] : memref<2x32x96xbf16, #tpu.memory_space<vmem>>, vector<1x32x96xbf16>
    %35 = vector.shape_cast %34 : vector<1x32x96xbf16> to vector<32x96xbf16>
    %c0_11 = arith.constant 0 : index
    %c0_12 = arith.constant 0 : index
    %c0_13 = arith.constant 0 : index
    %36 = vector.load %arg5[%c0_11, %c0_12, %c0_13] : memref<2x32x32xbf16, #tpu.memory_space<vmem>>, vector<1x32x32xbf16>
    %37 = vector.shape_cast %36 : vector<1x32x32xbf16> to vector<32x32xbf16>
    %c0_14 = arith.constant 0 : index
    %c0_15 = arith.constant 0 : index
    %c0_16 = arith.constant 0 : index
    %38 = vector.load %arg6[%c0_14, %c0_15, %c0_16] : memref<2x32x64xbf16, #tpu.memory_space<vmem>>, vector<1x32x64xbf16>
    %39 = vector.shape_cast %38 : vector<1x32x64xbf16> to vector<32x64xbf16>
    %c0_17 = arith.constant 0 : index
    %c0_18 = arith.constant 0 : index
    %c0_19 = arith.constant 0 : index
    %40 = vector.load %arg7[%c0_17, %c0_18, %c0_19] : memref<2x64x32xbf16, #tpu.memory_space<vmem>>, vector<1x64x32xbf16>
    %41 = vector.shape_cast %40 : vector<1x64x32xbf16> to vector<64x32xbf16>
    %c0_20 = arith.constant 0 : index
    %c0_21 = arith.constant 0 : index
    %c0_22 = arith.constant 0 : index
    %42 = vector.load %arg8[%c0_20, %c0_21, %c0_22] : memref<2x8x96xf32, #tpu.memory_space<vmem>>, vector<1x8x96xf32>
    %43 = vector.shape_cast %42 : vector<1x8x96xf32> to vector<8x96xf32>
    %44 = vector.extract_strided_slice %43 {offsets = [0, 0], sizes = [1, 96], strides = [1, 1]} : vector<8x96xf32> to vector<1x96xf32>
    %45 = vector.extract_strided_slice %43 {offsets = [1, 0], sizes = [1, 32], strides = [1, 1]} : vector<8x96xf32> to vector<1x32xf32>
    %46 = vector.extract_strided_slice %43 {offsets = [2, 0], sizes = [1, 32], strides = [1, 1]} : vector<8x96xf32> to vector<1x32xf32>
    %47 = vector.extract_strided_slice %43 {offsets = [3, 0], sizes = [1, 32], strides = [1, 1]} : vector<8x96xf32> to vector<1x32xf32>
    %48 = vector.extract_strided_slice %43 {offsets = [4, 0], sizes = [1, 64], strides = [1, 1]} : vector<8x96xf32> to vector<1x64xf32>
    %49 = vector.extract_strided_slice %43 {offsets = [5, 0], sizes = [1, 32], strides = [1, 1]} : vector<8x96xf32> to vector<1x32xf32>
    %50 = vector.extract_strided_slice %43 {offsets = [6, 0], sizes = [1, 32], strides = [1, 1]} : vector<8x96xf32> to vector<1x32xf32>
    %51 = vector.extract_strided_slice %43 {offsets = [7, 0], sizes = [1, 32], strides = [1, 1]} : vector<8x96xf32> to vector<1x32xf32>
    %52 = arith.truncf %22 : vector<16x32xf32> to vector<16x32xbf16>
    %cst_23 = arith.constant dense<0.000000e+00> : vector<16x96xf32>
    %53 = tpu.matmul %52, %35, %cst_23 {dimension_numbers = #tpu.dot_dimension_numbers<[1], [0], [0], [1], [0, 0, 1, 1], [], []>} : vector<16x32xbf16>, vector<32x96xbf16>, vector<16x96xf32> -> vector<16x96xf32>
    %54 = vector.broadcast %44 : vector<1x96xf32> to vector<16x96xf32>
    %55 = arith.addf %53, %54 : vector<16x96xf32>
    %56 = vector.extract_strided_slice %55 {offsets = [0, 0], sizes = [16, 8], strides = [1, 1]} : vector<16x96xf32> to vector<16x8xf32>
    %57 = vector.extract_strided_slice %55 {offsets = [0, 8], sizes = [16, 8], strides = [1, 1]} : vector<16x96xf32> to vector<16x8xf32>
    %58 = vector.extract_strided_slice %55 {offsets = [0, 16], sizes = [16, 8], strides = [1, 1]} : vector<16x96xf32> to vector<16x8xf32>
    %59 = vector.extract_strided_slice %55 {offsets = [0, 24], sizes = [16, 8], strides = [1, 1]} : vector<16x96xf32> to vector<16x8xf32>
    %60 = vector.shape_cast %56 : vector<16x8xf32> to vector<1x16x8xf32>
    %61 = vector.shape_cast %57 : vector<16x8xf32> to vector<1x16x8xf32>
    %62 = vector.shape_cast %58 : vector<16x8xf32> to vector<1x16x8xf32>
    %63 = vector.shape_cast %59 : vector<16x8xf32> to vector<1x16x8xf32>
    %64 = tpu.concatenate %60, %61, %62, %63 in 0 : vector<1x16x8xf32>, vector<1x16x8xf32>, vector<1x16x8xf32>, vector<1x16x8xf32> -> vector<4x16x8xf32>
    %65 = vector.extract_strided_slice %55 {offsets = [0, 32], sizes = [16, 8], strides = [1, 1]} : vector<16x96xf32> to vector<16x8xf32>
    %66 = vector.extract_strided_slice %55 {offsets = [0, 40], sizes = [16, 8], strides = [1, 1]} : vector<16x96xf32> to vector<16x8xf32>
    %67 = vector.extract_strided_slice %55 {offsets = [0, 48], sizes = [16, 8], strides = [1, 1]} : vector<16x96xf32> to vector<16x8xf32>
    %68 = vector.extract_strided_slice %55 {offsets = [0, 56], sizes = [16, 8], strides = [1, 1]} : vector<16x96xf32> to vector<16x8xf32>
    %69 = vector.shape_cast %65 : vector<16x8xf32> to vector<1x16x8xf32>
    %70 = vector.shape_cast %66 : vector<16x8xf32> to vector<1x16x8xf32>
    %71 = vector.shape_cast %67 : vector<16x8xf32> to vector<1x16x8xf32>
    %72 = vector.shape_cast %68 : vector<16x8xf32> to vector<1x16x8xf32>
    %73 = tpu.concatenate %69, %70, %71, %72 in 0 : vector<1x16x8xf32>, vector<1x16x8xf32>, vector<1x16x8xf32>, vector<1x16x8xf32> -> vector<4x16x8xf32>
    %74 = vector.extract_strided_slice %55 {offsets = [0, 64], sizes = [16, 8], strides = [1, 1]} : vector<16x96xf32> to vector<16x8xf32>
    %75 = vector.extract_strided_slice %55 {offsets = [0, 72], sizes = [16, 8], strides = [1, 1]} : vector<16x96xf32> to vector<16x8xf32>
    %76 = vector.extract_strided_slice %55 {offsets = [0, 80], sizes = [16, 8], strides = [1, 1]} : vector<16x96xf32> to vector<16x8xf32>
    %77 = vector.extract_strided_slice %55 {offsets = [0, 88], sizes = [16, 8], strides = [1, 1]} : vector<16x96xf32> to vector<16x8xf32>
    %78 = vector.shape_cast %74 : vector<16x8xf32> to vector<1x16x8xf32>
    %79 = vector.shape_cast %75 : vector<16x8xf32> to vector<1x16x8xf32>
    %80 = vector.shape_cast %76 : vector<16x8xf32> to vector<1x16x8xf32>
    %81 = vector.shape_cast %77 : vector<16x8xf32> to vector<1x16x8xf32>
    %82 = tpu.concatenate %78, %79, %80, %81 in 0 : vector<1x16x8xf32>, vector<1x16x8xf32>, vector<1x16x8xf32>, vector<1x16x8xf32> -> vector<4x16x8xf32>
    %83 = arith.truncf %64 : vector<4x16x8xf32> to vector<4x16x8xbf16>
    %84 = arith.truncf %73 : vector<4x16x8xf32> to vector<4x16x8xbf16>
    "tpu.trace_start"() <{level = 10 : i32, message = "hqd,hkd->hqk"}> : () -> ()
    %cst_24 = arith.constant dense<0.000000e+00> : vector<4x16x16xf32>
    %85 = tpu.matmul %83, %84, %cst_24 {dimension_numbers = #tpu.dot_dimension_numbers<[2], [2], [1], [1], [0, 0, 0, 1, 1, 1], [0], [0]>} : vector<4x16x8xbf16>, vector<4x16x8xbf16>, vector<4x16x16xf32> -> vector<4x16x16xf32>
    "tpu.trace_stop"() : () -> ()
    %cst_25 = arith.constant 0.353553385 : f32
    %86 = vector.broadcast %cst_25 : f32 to vector<4x16x16xf32>
    %87 = arith.mulf %85, %86 : vector<4x16x16xf32>
    %88 = vector.shape_cast %33 : vector<16x16xi1> to vector<1x16x16xi1>
    %cst_26 = arith.constant -1.000000e+09 : f32
    %89 = vector.shape_cast %88 : vector<1x16x16xi1> to vector<1x16x16xi1>
    %90 = vector.broadcast %89 : vector<1x16x16xi1> to vector<4x16x16xi1>
    %91 = vector.broadcast %cst_26 : f32 to vector<4x16x16xf32>
    %92 = arith.select %90, %91, %87 : vector<4x16x16xi1>, vector<4x16x16xf32>
    %cst_27 = arith.constant dense<0xFF800000> : vector<4x16xf32>
    %93 = vector.multi_reduction <maximumf>, %92, %cst_27 [2] : vector<4x16x16xf32> to vector<4x16xf32>
    %94 = vector.shape_cast %93 : vector<4x16xf32> to vector<4x16x1xf32>
    %95 = vector.broadcast %94 : vector<4x16x1xf32> to vector<4x16x16xf32>
    %96 = arith.subf %92, %95 : vector<4x16x16xf32>
    %97 = math.exp %96 : vector<4x16x16xf32>
    %cst_28 = arith.constant dense<0.000000e+00> : vector<4x16xf32>
    %98 = vector.multi_reduction <add>, %97, %cst_28 [2] : vector<4x16x16xf32> to vector<4x16xf32>
    %99 = vector.shape_cast %98 : vector<4x16xf32> to vector<4x16x1xf32>
    %100 = tpu.reciprocal %99 {approx = true} : vector<4x16x1xf32> -> vector<4x16x1xf32>
    %101 = vector.broadcast %100 : vector<4x16x1xf32> to vector<4x16x16xf32>
    %102 = arith.mulf %97, %101 : vector<4x16x16xf32>
    %103 = arith.truncf %102 : vector<4x16x16xf32> to vector<4x16x16xbf16>
    %104 = arith.truncf %82 : vector<4x16x8xf32> to vector<4x16x8xbf16>
    "tpu.trace_start"() <{level = 10 : i32, message = "hqk,hkd->hqd"}> : () -> ()
    %cst_29 = arith.constant dense<0.000000e+00> : vector<4x16x8xf32>
    %105 = tpu.matmul %103, %104, %cst_29 {dimension_numbers = #tpu.dot_dimension_numbers<[2], [1], [1], [2], [0, 0, 0, 1, 1, 2], [0], [0]>} : vector<4x16x16xbf16>, vector<4x16x8xbf16>, vector<4x16x8xf32> -> vector<4x16x8xf32>
    "tpu.trace_stop"() : () -> ()
    %106 = vector.extract_strided_slice %105 {offsets = [0, 0, 0], sizes = [1, 16, 8], strides = [1, 1, 1]} : vector<4x16x8xf32> to vector<1x16x8xf32>
    %107 = vector.shape_cast %106 : vector<1x16x8xf32> to vector<16x8xf32>
    %108 = vector.extract_strided_slice %105 {offsets = [1, 0, 0], sizes = [1, 16, 8], strides = [1, 1, 1]} : vector<4x16x8xf32> to vector<1x16x8xf32>
    %109 = vector.shape_cast %108 : vector<1x16x8xf32> to vector<16x8xf32>
    %110 = vector.extract_strided_slice %105 {offsets = [2, 0, 0], sizes = [1, 16, 8], strides = [1, 1, 1]} : vector<4x16x8xf32> to vector<1x16x8xf32>
    %111 = vector.shape_cast %110 : vector<1x16x8xf32> to vector<16x8xf32>
    %112 = vector.extract_strided_slice %105 {offsets = [3, 0, 0], sizes = [1, 16, 8], strides = [1, 1, 1]} : vector<4x16x8xf32> to vector<1x16x8xf32>
    %113 = vector.shape_cast %112 : vector<1x16x8xf32> to vector<16x8xf32>
    %114 = tpu.concatenate %107, %109, %111, %113 in 1 : vector<16x8xf32>, vector<16x8xf32>, vector<16x8xf32>, vector<16x8xf32> -> vector<16x32xf32>
    %115 = arith.truncf %114 : vector<16x32xf32> to vector<16x32xbf16>
    %cst_30 = arith.constant dense<0.000000e+00> : vector<16x32xf32>
    %116 = tpu.matmul %115, %37, %cst_30 {dimension_numbers = #tpu.dot_dimension_numbers<[1], [0], [0], [1], [0, 0, 1, 1], [], []>} : vector<16x32xbf16>, vector<32x32xbf16>, vector<16x32xf32> -> vector<16x32xf32>
    %117 = vector.broadcast %45 : vector<1x32xf32> to vector<16x32xf32>
    %118 = arith.addf %116, %117 : vector<16x32xf32>
    %119 = arith.addf %22, %118 : vector<16x32xf32>
    %cst_31 = arith.constant dense<0.000000e+00> : vector<16xf32>
    %120 = vector.multi_reduction <add>, %119, %cst_31 [1] : vector<16x32xf32> to vector<16xf32>
    %121 = vector.shape_cast %120 : vector<16xf32> to vector<16x1xf32>
    %cst_32 = arith.constant 3.200000e+01 : f32
    %122 = vector.broadcast %cst_32 : f32 to vector<16x1xf32>
    %123 = arith.divf %121, %122 : vector<16x1xf32>
    %124 = vector.broadcast %123 : vector<16x1xf32> to vector<16x32xf32>
    %125 = arith.subf %119, %124 : vector<16x32xf32>
    %126 = arith.mulf %125, %125 : vector<16x32xf32>
    %cst_33 = arith.constant dense<0.000000e+00> : vector<16xf32>
    %127 = vector.multi_reduction <add>, %126, %cst_33 [1] : vector<16x32xf32> to vector<16xf32>
    %128 = vector.shape_cast %127 : vector<16xf32> to vector<16x1xf32>
    %cst_34 = arith.constant 3.200000e+01 : f32
    %129 = vector.broadcast %cst_34 : f32 to vector<16x1xf32>
    %130 = arith.divf %128, %129 : vector<16x1xf32>
    %131 = vector.broadcast %123 : vector<16x1xf32> to vector<16x32xf32>
    %132 = arith.subf %119, %131 : vector<16x32xf32>
    %cst_35 = arith.constant 9.99999997E-7 : f32
    %133 = vector.broadcast %cst_35 : f32 to vector<16x1xf32>
    %134 = arith.addf %130, %133 : vector<16x1xf32>
    %135 = math.rsqrt %134 : vector<16x1xf32>
    %136 = vector.broadcast %135 : vector<16x1xf32> to vector<16x32xf32>
    %137 = arith.mulf %132, %136 : vector<16x32xf32>
    %138 = vector.broadcast %46 : vector<1x32xf32> to vector<16x32xf32>
    %139 = arith.mulf %137, %138 : vector<16x32xf32>
    %140 = vector.broadcast %47 : vector<1x32xf32> to vector<16x32xf32>
    %141 = arith.addf %139, %140 : vector<16x32xf32>
    %142 = arith.truncf %141 : vector<16x32xf32> to vector<16x32xbf16>
    %cst_36 = arith.constant dense<0.000000e+00> : vector<16x64xf32>
    %143 = tpu.matmul %142, %39, %cst_36 {dimension_numbers = #tpu.dot_dimension_numbers<[1], [0], [0], [1], [0, 0, 1, 1], [], []>} : vector<16x32xbf16>, vector<32x64xbf16>, vector<16x64xf32> -> vector<16x64xf32>
    %144 = vector.broadcast %48 : vector<1x64xf32> to vector<16x64xf32>
    %145 = arith.addf %143, %144 : vector<16x64xf32>
    %cst_37 = arith.constant 0.000000e+00 : f32
    %146 = vector.broadcast %cst_37 : f32 to vector<16x64xf32>
    %147 = arith.maximumf %145, %146 : vector<16x64xf32>
    %148 = arith.truncf %147 : vector<16x64xf32> to vector<16x64xbf16>
    %cst_38 = arith.constant dense<0.000000e+00> : vector<16x32xf32>
    %149 = tpu.matmul %148, %41, %cst_38 {dimension_numbers = #tpu.dot_dimension_numbers<[1], [0], [0], [1], [0, 0, 1, 1], [], []>} : vector<16x64xbf16>, vector<64x32xbf16>, vector<16x32xf32> -> vector<16x32xf32>
    %150 = vector.broadcast %49 : vector<1x32xf32> to vector<16x32xf32>
    %151 = arith.addf %149, %150 : vector<16x32xf32>
    %152 = arith.addf %141, %151 : vector<16x32xf32>
    %cst_39 = arith.constant dense<0.000000e+00> : vector<16xf32>
    %153 = vector.multi_reduction <add>, %152, %cst_39 [1] : vector<16x32xf32> to vector<16xf32>
    %154 = vector.shape_cast %153 : vector<16xf32> to vector<16x1xf32>
    %cst_40 = arith.constant 3.200000e+01 : f32
    %155 = vector.broadcast %cst_40 : f32 to vector<16x1xf32>
    %156 = arith.divf %154, %155 : vector<16x1xf32>
    %157 = vector.broadcast %156 : vector<16x1xf32> to vector<16x32xf32>
    %158 = arith.subf %152, %157 : vector<16x32xf32>
    %159 = arith.mulf %158, %158 : vector<16x32xf32>
    %cst_41 = arith.constant dense<0.000000e+00> : vector<16xf32>
    %160 = vector.multi_reduction <add>, %159, %cst_41 [1] : vector<16x32xf32> to vector<16xf32>
    %161 = vector.shape_cast %160 : vector<16xf32> to vector<16x1xf32>
    %cst_42 = arith.constant 3.200000e+01 : f32
    %162 = vector.broadcast %cst_42 : f32 to vector<16x1xf32>
    %163 = arith.divf %161, %162 : vector<16x1xf32>
    %164 = vector.broadcast %156 : vector<16x1xf32> to vector<16x32xf32>
    %165 = arith.subf %152, %164 : vector<16x32xf32>
    %cst_43 = arith.constant 9.99999997E-7 : f32
    %166 = vector.broadcast %cst_43 : f32 to vector<16x1xf32>
    %167 = arith.addf %163, %166 : vector<16x1xf32>
    %168 = math.rsqrt %167 : vector<16x1xf32>
    %169 = vector.broadcast %168 : vector<16x1xf32> to vector<16x32xf32>
    %170 = arith.mulf %165, %169 : vector<16x32xf32>
    %171 = vector.broadcast %50 : vector<1x32xf32> to vector<16x32xf32>
    %172 = arith.mulf %170, %171 : vector<16x32xf32>
    %173 = vector.broadcast %51 : vector<1x32xf32> to vector<16x32xf32>
    %174 = arith.addf %172, %173 : vector<16x32xf32>
    %c1 = arith.constant 1 : index
    %c0_44 = arith.constant 0 : index
    %c0_45 = arith.constant 0 : index
    %175 = vector.load %arg4[%c1, %c0_44, %c0_45] : memref<2x32x96xbf16, #tpu.memory_space<vmem>>, vector<1x32x96xbf16>
    %176 = vector.shape_cast %175 : vector<1x32x96xbf16> to vector<32x96xbf16>
    %c1_46 = arith.constant 1 : index
    %c0_47 = arith.constant 0 : index
    %c0_48 = arith.constant 0 : index
    %177 = vector.load %arg5[%c1_46, %c0_47, %c0_48] : memref<2x32x32xbf16, #tpu.memory_space<vmem>>, vector<1x32x32xbf16>
    %178 = vector.shape_cast %177 : vector<1x32x32xbf16> to vector<32x32xbf16>
    %c1_49 = arith.constant 1 : index
    %c0_50 = arith.constant 0 : index
    %c0_51 = arith.constant 0 : index
    %179 = vector.load %arg6[%c1_49, %c0_50, %c0_51] : memref<2x32x64xbf16, #tpu.memory_space<vmem>>, vector<1x32x64xbf16>
    %180 = vector.shape_cast %179 : vector<1x32x64xbf16> to vector<32x64xbf16>
    %c1_52 = arith.constant 1 : index
    %c0_53 = arith.constant 0 : index
    %c0_54 = arith.constant 0 : index
    %181 = vector.load %arg7[%c1_52, %c0_53, %c0_54] : memref<2x64x32xbf16, #tpu.memory_space<vmem>>, vector<1x64x32xbf16>
    %182 = vector.shape_cast %181 : vector<1x64x32xbf16> to vector<64x32xbf16>
    %c1_55 = arith.constant 1 : index
    %c0_56 = arith.constant 0 : index
    %c0_57 = arith.constant 0 : index
    %183 = vector.load %arg8[%c1_55, %c0_56, %c0_57] : memref<2x8x96xf32, #tpu.memory_space<vmem>>, vector<1x8x96xf32>
    %184 = vector.shape_cast %183 : vector<1x8x96xf32> to vector<8x96xf32>
    %185 = vector.extract_strided_slice %184 {offsets = [0, 0], sizes = [1, 96], strides = [1, 1]} : vector<8x96xf32> to vector<1x96xf32>
    %186 = vector.extract_strided_slice %184 {offsets = [1, 0], sizes = [1, 32], strides = [1, 1]} : vector<8x96xf32> to vector<1x32xf32>
    %187 = vector.extract_strided_slice %184 {offsets = [2, 0], sizes = [1, 32], strides = [1, 1]} : vector<8x96xf32> to vector<1x32xf32>
    %188 = vector.extract_strided_slice %184 {offsets = [3, 0], sizes = [1, 32], strides = [1, 1]} : vector<8x96xf32> to vector<1x32xf32>
    %189 = vector.extract_strided_slice %184 {offsets = [4, 0], sizes = [1, 64], strides = [1, 1]} : vector<8x96xf32> to vector<1x64xf32>
    %190 = vector.extract_strided_slice %184 {offsets = [5, 0], sizes = [1, 32], strides = [1, 1]} : vector<8x96xf32> to vector<1x32xf32>
    %191 = vector.extract_strided_slice %184 {offsets = [6, 0], sizes = [1, 32], strides = [1, 1]} : vector<8x96xf32> to vector<1x32xf32>
    %192 = vector.extract_strided_slice %184 {offsets = [7, 0], sizes = [1, 32], strides = [1, 1]} : vector<8x96xf32> to vector<1x32xf32>
    %193 = arith.truncf %174 : vector<16x32xf32> to vector<16x32xbf16>
    %cst_58 = arith.constant dense<0.000000e+00> : vector<16x96xf32>
    %194 = tpu.matmul %193, %176, %cst_58 {dimension_numbers = #tpu.dot_dimension_numbers<[1], [0], [0], [1], [0, 0, 1, 1], [], []>} : vector<16x32xbf16>, vector<32x96xbf16>, vector<16x96xf32> -> vector<16x96xf32>
    %195 = vector.broadcast %185 : vector<1x96xf32> to vector<16x96xf32>
    %196 = arith.addf %194, %195 : vector<16x96xf32>
    %197 = vector.extract_strided_slice %196 {offsets = [0, 0], sizes = [16, 8], strides = [1, 1]} : vector<16x96xf32> to vector<16x8xf32>
    %198 = vector.extract_strided_slice %196 {offsets = [0, 8], sizes = [16, 8], strides = [1, 1]} : vector<16x96xf32> to vector<16x8xf32>
    %199 = vector.extract_strided_slice %196 {offsets = [0, 16], sizes = [16, 8], strides = [1, 1]} : vector<16x96xf32> to vector<16x8xf32>
    %200 = vector.extract_strided_slice %196 {offsets = [0, 24], sizes = [16, 8], strides = [1, 1]} : vector<16x96xf32> to vector<16x8xf32>
    %201 = vector.shape_cast %197 : vector<16x8xf32> to vector<1x16x8xf32>
    %202 = vector.shape_cast %198 : vector<16x8xf32> to vector<1x16x8xf32>
    %203 = vector.shape_cast %199 : vector<16x8xf32> to vector<1x16x8xf32>
    %204 = vector.shape_cast %200 : vector<16x8xf32> to vector<1x16x8xf32>
    %205 = tpu.concatenate %201, %202, %203, %204 in 0 : vector<1x16x8xf32>, vector<1x16x8xf32>, vector<1x16x8xf32>, vector<1x16x8xf32> -> vector<4x16x8xf32>
    %206 = vector.extract_strided_slice %196 {offsets = [0, 32], sizes = [16, 8], strides = [1, 1]} : vector<16x96xf32> to vector<16x8xf32>
    %207 = vector.extract_strided_slice %196 {offsets = [0, 40], sizes = [16, 8], strides = [1, 1]} : vector<16x96xf32> to vector<16x8xf32>
    %208 = vector.extract_strided_slice %196 {offsets = [0, 48], sizes = [16, 8], strides = [1, 1]} : vector<16x96xf32> to vector<16x8xf32>
    %209 = vector.extract_strided_slice %196 {offsets = [0, 56], sizes = [16, 8], strides = [1, 1]} : vector<16x96xf32> to vector<16x8xf32>
    %210 = vector.shape_cast %206 : vector<16x8xf32> to vector<1x16x8xf32>
    %211 = vector.shape_cast %207 : vector<16x8xf32> to vector<1x16x8xf32>
    %212 = vector.shape_cast %208 : vector<16x8xf32> to vector<1x16x8xf32>
    %213 = vector.shape_cast %209 : vector<16x8xf32> to vector<1x16x8xf32>
    %214 = tpu.concatenate %210, %211, %212, %213 in 0 : vector<1x16x8xf32>, vector<1x16x8xf32>, vector<1x16x8xf32>, vector<1x16x8xf32> -> vector<4x16x8xf32>
    %215 = vector.extract_strided_slice %196 {offsets = [0, 64], sizes = [16, 8], strides = [1, 1]} : vector<16x96xf32> to vector<16x8xf32>
    %216 = vector.extract_strided_slice %196 {offsets = [0, 72], sizes = [16, 8], strides = [1, 1]} : vector<16x96xf32> to vector<16x8xf32>
    %217 = vector.extract_strided_slice %196 {offsets = [0, 80], sizes = [16, 8], strides = [1, 1]} : vector<16x96xf32> to vector<16x8xf32>
    %218 = vector.extract_strided_slice %196 {offsets = [0, 88], sizes = [16, 8], strides = [1, 1]} : vector<16x96xf32> to vector<16x8xf32>
    %219 = vector.shape_cast %215 : vector<16x8xf32> to vector<1x16x8xf32>
    %220 = vector.shape_cast %216 : vector<16x8xf32> to vector<1x16x8xf32>
    %221 = vector.shape_cast %217 : vector<16x8xf32> to vector<1x16x8xf32>
    %222 = vector.shape_cast %218 : vector<16x8xf32> to vector<1x16x8xf32>
    %223 = tpu.concatenate %219, %220, %221, %222 in 0 : vector<1x16x8xf32>, vector<1x16x8xf32>, vector<1x16x8xf32>, vector<1x16x8xf32> -> vector<4x16x8xf32>
    %224 = arith.truncf %205 : vector<4x16x8xf32> to vector<4x16x8xbf16>
    %225 = arith.truncf %214 : vector<4x16x8xf32> to vector<4x16x8xbf16>
    "tpu.trace_start"() <{level = 10 : i32, message = "hqd,hkd->hqk"}> : () -> ()
    %cst_59 = arith.constant dense<0.000000e+00> : vector<4x16x16xf32>
    %226 = tpu.matmul %224, %225, %cst_59 {dimension_numbers = #tpu.dot_dimension_numbers<[2], [2], [1], [1], [0, 0, 0, 1, 1, 1], [0], [0]>} : vector<4x16x8xbf16>, vector<4x16x8xbf16>, vector<4x16x16xf32> -> vector<4x16x16xf32>
    "tpu.trace_stop"() : () -> ()
    %cst_60 = arith.constant 0.353553385 : f32
    %227 = vector.broadcast %cst_60 : f32 to vector<4x16x16xf32>
    %228 = arith.mulf %226, %227 : vector<4x16x16xf32>
    %229 = vector.shape_cast %33 : vector<16x16xi1> to vector<1x16x16xi1>
    %cst_61 = arith.constant -1.000000e+09 : f32
    %230 = vector.shape_cast %229 : vector<1x16x16xi1> to vector<1x16x16xi1>
    %231 = vector.broadcast %230 : vector<1x16x16xi1> to vector<4x16x16xi1>
    %232 = vector.broadcast %cst_61 : f32 to vector<4x16x16xf32>
    %233 = arith.select %231, %232, %228 : vector<4x16x16xi1>, vector<4x16x16xf32>
    %cst_62 = arith.constant dense<0xFF800000> : vector<4x16xf32>
    %234 = vector.multi_reduction <maximumf>, %233, %cst_62 [2] : vector<4x16x16xf32> to vector<4x16xf32>
    %235 = vector.shape_cast %234 : vector<4x16xf32> to vector<4x16x1xf32>
    %236 = vector.broadcast %235 : vector<4x16x1xf32> to vector<4x16x16xf32>
    %237 = arith.subf %233, %236 : vector<4x16x16xf32>
    %238 = math.exp %237 : vector<4x16x16xf32>
    %cst_63 = arith.constant dense<0.000000e+00> : vector<4x16xf32>
    %239 = vector.multi_reduction <add>, %238, %cst_63 [2] : vector<4x16x16xf32> to vector<4x16xf32>
    %240 = vector.shape_cast %239 : vector<4x16xf32> to vector<4x16x1xf32>
    %241 = tpu.reciprocal %240 {approx = true} : vector<4x16x1xf32> -> vector<4x16x1xf32>
    %242 = vector.broadcast %241 : vector<4x16x1xf32> to vector<4x16x16xf32>
    %243 = arith.mulf %238, %242 : vector<4x16x16xf32>
    %244 = arith.truncf %243 : vector<4x16x16xf32> to vector<4x16x16xbf16>
    %245 = arith.truncf %223 : vector<4x16x8xf32> to vector<4x16x8xbf16>
    "tpu.trace_start"() <{level = 10 : i32, message = "hqk,hkd->hqd"}> : () -> ()
    %cst_64 = arith.constant dense<0.000000e+00> : vector<4x16x8xf32>
    %246 = tpu.matmul %244, %245, %cst_64 {dimension_numbers = #tpu.dot_dimension_numbers<[2], [1], [1], [2], [0, 0, 0, 1, 1, 2], [0], [0]>} : vector<4x16x16xbf16>, vector<4x16x8xbf16>, vector<4x16x8xf32> -> vector<4x16x8xf32>
    "tpu.trace_stop"() : () -> ()
    %247 = vector.extract_strided_slice %246 {offsets = [0, 0, 0], sizes = [1, 16, 8], strides = [1, 1, 1]} : vector<4x16x8xf32> to vector<1x16x8xf32>
    %248 = vector.shape_cast %247 : vector<1x16x8xf32> to vector<16x8xf32>
    %249 = vector.extract_strided_slice %246 {offsets = [1, 0, 0], sizes = [1, 16, 8], strides = [1, 1, 1]} : vector<4x16x8xf32> to vector<1x16x8xf32>
    %250 = vector.shape_cast %249 : vector<1x16x8xf32> to vector<16x8xf32>
    %251 = vector.extract_strided_slice %246 {offsets = [2, 0, 0], sizes = [1, 16, 8], strides = [1, 1, 1]} : vector<4x16x8xf32> to vector<1x16x8xf32>
    %252 = vector.shape_cast %251 : vector<1x16x8xf32> to vector<16x8xf32>
    %253 = vector.extract_strided_slice %246 {offsets = [3, 0, 0], sizes = [1, 16, 8], strides = [1, 1, 1]} : vector<4x16x8xf32> to vector<1x16x8xf32>
    %254 = vector.shape_cast %253 : vector<1x16x8xf32> to vector<16x8xf32>
    %255 = tpu.concatenate %248, %250, %252, %254 in 1 : vector<16x8xf32>, vector<16x8xf32>, vector<16x8xf32>, vector<16x8xf32> -> vector<16x32xf32>
    %256 = arith.truncf %255 : vector<16x32xf32> to vector<16x32xbf16>
    %cst_65 = arith.constant dense<0.000000e+00> : vector<16x32xf32>
    %257 = tpu.matmul %256, %178, %cst_65 {dimension_numbers = #tpu.dot_dimension_numbers<[1], [0], [0], [1], [0, 0, 1, 1], [], []>} : vector<16x32xbf16>, vector<32x32xbf16>, vector<16x32xf32> -> vector<16x32xf32>
    %258 = vector.broadcast %186 : vector<1x32xf32> to vector<16x32xf32>
    %259 = arith.addf %257, %258 : vector<16x32xf32>
    %260 = arith.addf %174, %259 : vector<16x32xf32>
    %cst_66 = arith.constant dense<0.000000e+00> : vector<16xf32>
    %261 = vector.multi_reduction <add>, %260, %cst_66 [1] : vector<16x32xf32> to vector<16xf32>
    %262 = vector.shape_cast %261 : vector<16xf32> to vector<16x1xf32>
    %cst_67 = arith.constant 3.200000e+01 : f32
    %263 = vector.broadcast %cst_67 : f32 to vector<16x1xf32>
    %264 = arith.divf %262, %263 : vector<16x1xf32>
    %265 = vector.broadcast %264 : vector<16x1xf32> to vector<16x32xf32>
    %266 = arith.subf %260, %265 : vector<16x32xf32>
    %267 = arith.mulf %266, %266 : vector<16x32xf32>
    %cst_68 = arith.constant dense<0.000000e+00> : vector<16xf32>
    %268 = vector.multi_reduction <add>, %267, %cst_68 [1] : vector<16x32xf32> to vector<16xf32>
    %269 = vector.shape_cast %268 : vector<16xf32> to vector<16x1xf32>
    %cst_69 = arith.constant 3.200000e+01 : f32
    %270 = vector.broadcast %cst_69 : f32 to vector<16x1xf32>
    %271 = arith.divf %269, %270 : vector<16x1xf32>
    %272 = vector.broadcast %264 : vector<16x1xf32> to vector<16x32xf32>
    %273 = arith.subf %260, %272 : vector<16x32xf32>
    %cst_70 = arith.constant 9.99999997E-7 : f32
    %274 = vector.broadcast %cst_70 : f32 to vector<16x1xf32>
    %275 = arith.addf %271, %274 : vector<16x1xf32>
    %276 = math.rsqrt %275 : vector<16x1xf32>
    %277 = vector.broadcast %276 : vector<16x1xf32> to vector<16x32xf32>
    %278 = arith.mulf %273, %277 : vector<16x32xf32>
    %279 = vector.broadcast %187 : vector<1x32xf32> to vector<16x32xf32>
    %280 = arith.mulf %278, %279 : vector<16x32xf32>
    %281 = vector.broadcast %188 : vector<1x32xf32> to vector<16x32xf32>
    %282 = arith.addf %280, %281 : vector<16x32xf32>
    %283 = arith.truncf %282 : vector<16x32xf32> to vector<16x32xbf16>
    %cst_71 = arith.constant dense<0.000000e+00> : vector<16x64xf32>
    %284 = tpu.matmul %283, %180, %cst_71 {dimension_numbers = #tpu.dot_dimension_numbers<[1], [0], [0], [1], [0, 0, 1, 1], [], []>} : vector<16x32xbf16>, vector<32x64xbf16>, vector<16x64xf32> -> vector<16x64xf32>
    %285 = vector.broadcast %189 : vector<1x64xf32> to vector<16x64xf32>
    %286 = arith.addf %284, %285 : vector<16x64xf32>
    %cst_72 = arith.constant 0.000000e+00 : f32
    %287 = vector.broadcast %cst_72 : f32 to vector<16x64xf32>
    %288 = arith.maximumf %286, %287 : vector<16x64xf32>
    %289 = arith.truncf %288 : vector<16x64xf32> to vector<16x64xbf16>
    %cst_73 = arith.constant dense<0.000000e+00> : vector<16x32xf32>
    %290 = tpu.matmul %289, %182, %cst_73 {dimension_numbers = #tpu.dot_dimension_numbers<[1], [0], [0], [1], [0, 0, 1, 1], [], []>} : vector<16x64xbf16>, vector<64x32xbf16>, vector<16x32xf32> -> vector<16x32xf32>
    %291 = vector.broadcast %190 : vector<1x32xf32> to vector<16x32xf32>
    %292 = arith.addf %290, %291 : vector<16x32xf32>
    %293 = arith.addf %282, %292 : vector<16x32xf32>
    %cst_74 = arith.constant dense<0.000000e+00> : vector<16xf32>
    %294 = vector.multi_reduction <add>, %293, %cst_74 [1] : vector<16x32xf32> to vector<16xf32>
    %295 = vector.shape_cast %294 : vector<16xf32> to vector<16x1xf32>
    %cst_75 = arith.constant 3.200000e+01 : f32
    %296 = vector.broadcast %cst_75 : f32 to vector<16x1xf32>
    %297 = arith.divf %295, %296 : vector<16x1xf32>
    %298 = vector.broadcast %297 : vector<16x1xf32> to vector<16x32xf32>
    %299 = arith.subf %293, %298 : vector<16x32xf32>
    %300 = arith.mulf %299, %299 : vector<16x32xf32>
    %cst_76 = arith.constant dense<0.000000e+00> : vector<16xf32>
    %301 = vector.multi_reduction <add>, %300, %cst_76 [1] : vector<16x32xf32> to vector<16xf32>
    %302 = vector.shape_cast %301 : vector<16xf32> to vector<16x1xf32>
    %cst_77 = arith.constant 3.200000e+01 : f32
    %303 = vector.broadcast %cst_77 : f32 to vector<16x1xf32>
    %304 = arith.divf %302, %303 : vector<16x1xf32>
    %305 = vector.broadcast %297 : vector<16x1xf32> to vector<16x32xf32>
    %306 = arith.subf %293, %305 : vector<16x32xf32>
    %cst_78 = arith.constant 9.99999997E-7 : f32
    %307 = vector.broadcast %cst_78 : f32 to vector<16x1xf32>
    %308 = arith.addf %304, %307 : vector<16x1xf32>
    %309 = math.rsqrt %308 : vector<16x1xf32>
    %310 = vector.broadcast %309 : vector<16x1xf32> to vector<16x32xf32>
    %311 = arith.mulf %306, %310 : vector<16x32xf32>
    %312 = vector.broadcast %191 : vector<1x32xf32> to vector<16x32xf32>
    %313 = arith.mulf %311, %312 : vector<16x32xf32>
    %314 = vector.broadcast %192 : vector<1x32xf32> to vector<16x32xf32>
    %315 = arith.addf %313, %314 : vector<16x32xf32>
    %c0_79 = arith.constant 0 : index
    %c0_80 = arith.constant 0 : index
    %316 = vector.load %arg9[%c0_79, %c0_80] : memref<33x128xf32, #tpu.memory_space<vmem>>, vector<32x128xf32>
    %317 = arith.truncf %316 : vector<32x128xf32> to vector<32x128xbf16>
    %c32 = arith.constant 32 : index
    %c0_81 = arith.constant 0 : index
    %318 = vector.load %arg9[%c32, %c0_81] : memref<33x128xf32, #tpu.memory_space<vmem>>, vector<1x128xf32>
    %319 = arith.truncf %315 : vector<16x32xf32> to vector<16x32xbf16>
    %cst_82 = arith.constant dense<0.000000e+00> : vector<16x128xf32>
    %320 = tpu.matmul %319, %317, %cst_82 {dimension_numbers = #tpu.dot_dimension_numbers<[1], [0], [0], [1], [0, 0, 1, 1], [], []>} : vector<16x32xbf16>, vector<32x128xbf16>, vector<16x128xf32> -> vector<16x128xf32>
    %321 = vector.broadcast %318 : vector<1x128xf32> to vector<16x128xf32>
    %322 = arith.addf %320, %321 : vector<16x128xf32>
    %c0_83 = arith.constant 0 : index
    %c0_84 = arith.constant 0 : index
    %323 = vector.load %arg10[%c0_83, %c0_84] : memref<16x128xf32, #tpu.memory_space<vmem>>, vector<16x128xf32>
    tpu.vector_store %arg10[%c0_83, %c0_84], %322 {strides = array<i32>} : memref<16x128xf32, #tpu.memory_space<vmem>>, vector<16x128xf32>,
    return
  }
  func.func @transform_0(%arg0: i32) -> (i32, i32) {
    %c0_i32 = arith.constant 0 : i32
    %c0_i32_0 = arith.constant 0 : i32
    %c0_i32_1 = arith.constant 0 : i32
    return %c0_i32, %c0_i32_0 : i32, i32
  }
  func.func @transform_1(%arg0: i32) -> (i32, i32) {
    %c0_i32 = arith.constant 0 : i32
    %c0_i32_0 = arith.constant 0 : i32
    %c0_i32_1 = arith.constant 0 : i32
    return %c0_i32, %c0_i32_0 : i32, i32
  }
  func.func @transform_2(%arg0: i32) -> (i32, i32) {
    %c0_i32 = arith.constant 0 : i32
    %c0_i32_0 = arith.constant 0 : i32
    %c0_i32_1 = arith.constant 0 : i32
    return %c0_i32, %c0_i32_0 : i32, i32
  }
  func.func @transform_3(%arg0: i32) -> (i32, i32, i32) {
    %c0_i32 = arith.constant 0 : i32
    %c0_i32_0 = arith.constant 0 : i32
    %c0_i32_1 = arith.constant 0 : i32
    %c0_i32_2 = arith.constant 0 : i32
    return %c0_i32, %c0_i32_0, %c0_i32_1 : i32, i32, i32
  }
  func.func @transform_4(%arg0: i32) -> (i32, i32, i32) {
    %c0_i32 = arith.constant 0 : i32
    %c0_i32_0 = arith.constant 0 : i32
    %c0_i32_1 = arith.constant 0 : i32
    %c0_i32_2 = arith.constant 0 : i32
    return %c0_i32, %c0_i32_0, %c0_i32_1 : i32, i32, i32
  }
  func.func @transform_5(%arg0: i32) -> (i32, i32, i32) {
    %c0_i32 = arith.constant 0 : i32
    %c0_i32_0 = arith.constant 0 : i32
    %c0_i32_1 = arith.constant 0 : i32
    %c0_i32_2 = arith.constant 0 : i32
    return %c0_i32, %c0_i32_0, %c0_i32_1 : i32, i32, i32
  }
  func.func @transform_6(%arg0: i32) -> (i32, i32, i32) {
    %c0_i32 = arith.constant 0 : i32
    %c0_i32_0 = arith.constant 0 : i32
    %c0_i32_1 = arith.constant 0 : i32
    %c0_i32_2 = arith.constant 0 : i32
    return %c0_i32, %c0_i32_0, %c0_i32_1 : i32, i32, i32
  }
  func.func @transform_7(%arg0: i32) -> (i32, i32, i32) {
    %c0_i32 = arith.constant 0 : i32
    %c0_i32_0 = arith.constant 0 : i32
    %c0_i32_1 = arith.constant 0 : i32
    %c0_i32_2 = arith.constant 0 : i32
    return %c0_i32, %c0_i32_0, %c0_i32_1 : i32, i32, i32
  }
  func.func @transform_8(%arg0: i32) -> (i32, i32) {
    %c0_i32 = arith.constant 0 : i32
    %c0_i32_0 = arith.constant 0 : i32
    %c0_i32_1 = arith.constant 0 : i32
    return %c0_i32, %c0_i32_0 : i32, i32
  }
  func.func @transform_9(%arg0: i32) -> (i32, i32) {
    %c0_i32 = arith.constant 0 : i32
    %c0_i32_0 = arith.constant 0 : i32
    %c0_i32_1 = arith.constant 0 : i32
    return %c0_i32, %c0_i32_0 : i32, i32
  }
}

</mosaic_0001>

<bundles_post_ra>
// kernel: lm_trm_forward.1
= control target key start
LH: loop header
LB: loop body
LE: loop exit
PB: predicated region body
PF: predicated region fallthrough
CT: control target
= control target key end

     0   :  { %v36_v0 = vlaneseq  ;;  %v2620_v1 = vmov 0   ;;  %vm90_vm6 = vcmask 1040384   ;;  %v2621_v37 = vmov 0.0   ;;  %s2624_s17 = smov 112   ;;  %s2626_s18 = smov 104   ;;  %s3201_s1 = inlined_call_operand.vmem [shape: s32[1,16], index: 1, kind: input, shape index: {}]   ;;  %s3202_s0 = inlined_call_operand.vmem [shape: s32[16,1], index: 0, kind: input, shape index: {}]   ;;  %s3203_s2 = inlined_call_operand.vmem [shape: f32[73,32], index: 2, kind: input, shape index: {}]   ;;  %s3204_s3 = inlined_call_operand.vmem [shape: bf16[2,32,96], index: 3, kind: input, shape index: {}]   ;;  %s3205_s7 = inlined_call_operand.vmem [shape: f32[2,8,96], index: 7, kind: input, shape index: {}]   ;;  %s3206_s4 = inlined_call_operand.vmem [shape: bf16[2,32,32], index: 4, kind: input, shape index: {}]   ;;  %s3207_s5 = inlined_call_operand.vmem [shape: bf16[2,32,64], index: 5, kind: input, shape index: {}]   ;;  %s3208_s6 = inlined_call_operand.vmem [shape: bf16[2,64,32], index: 6, kind: input, shape index: {}]   ;;  %s3209_s8 = inlined_call_operand.vmem [shape: f32[33,128], index: 8, kind: input, shape index: {}]   ;;  %s3210_s9 = inlined_call_operand.vmem [shape: f32[16,128], index: 9, kind: output, shape index: {}]  }
   0x1   :  { %2458 = vset.pattern.permute.xlu0 %v2620_v1  ;;  %v35_v2 = vld [vmem:[%s3201_s1] sm:$0x1]  ;;  %2459 = vset.pattern.permute.xlu1 %v2620_v1  ;;  %v34_v4 = vld [vmem:[%s3202_s0 + $0x8] sm:$0xff]  ;;  %v75_v10 = vld [vmem:[%s3203_s2 + $0x10] sm:$0xff]  ;;  %vm2622_vm7 = vmmov 1   ;;  %vm83_vm11 = vcmask 596992  }
   0x2   :  { %v33_v3 = vld [vmem:[%s3202_s0] sm:$0xff]  ;;  %v2691_v5 = vshrl.u32 %v36_v0, 7  ;;  %vm174_vm0 = vcmp.eq.s32.totalorder %v35_v2, 0  ;;  %53 = vperm.xlu1 %2459, %v34_v4   ;;  %v74_v7 = vld [vmem:[%s3203_s2 + $0x8] sm:$0xff]  ;;  %v76_v11 = vld [vmem:[%s3203_s2 + $0x18] sm:$0xff]  ;;  %v2705_v12 = vand.u32 127, %v36_v0  ;;  %2248 = vmatprep.subr.bf16.mxu1 %v2621_v37 }
   0x3   :  { %50 = vperm.xlu0 %2458, %v33_v3   ;;  %v73_v6 = vld [vmem:[%s3203_s2] sm:$0xff]  ;;  %v175_v8 = vsel %vm174_vm0, 1, %v2620_v1  ;;  %v78_v16 = vld [vmem:[%s3203_s2 + $0x28] sm:$0xff]  ;;  %vm45_vm1 = vcmp.eq.s32.totalorder %v33_v3, 0  ;;  %v2428_v18 = vpack.c.bf16 %v76_v11, %v75_v10  ;;  %vm46_vm2 = vcmp.eq.s32.totalorder %v34_v4, 0  ;;  %v79_v26 = vld [vmem:[%s3203_s2 + $0x30] sm:$0xff] }
   0x4   :  { %v2424_v9 = vpack.c.bf16 %v74_v7, %v73_v6  ;;  %v40_v13 = vadd.s32 8, %v2691_v5  ;;  %v2709_v14 = vsub.s32 0, %v2691_v5  ;;  %v77_v15 = vld [vmem:[%s3203_s2 + $0x20] sm:$0xff]  ;;  %v41_v17 = vand.u32 7, %v2691_v5  ;;  %v80_v27 = vld [vmem:[%s3203_s2 + $0x38] sm:$0xff]  ;;  %vm2441_vm8 = vmpackc.low %vm90_vm6, %vm2622_vm7  ;;  %s2625_s1 = smov 120  }
   0x5   :  { %v171_v20 = vshra.s32 %v2705_v12, 3  ;;  %v2432_v24 = vpack.c.bf16 %v78_v16, %v77_v15  ;;  %v2436_v34 = vpack.c.bf16 %v80_v27, %v79_v26  ;;  %v81_v35 = vld [vmem:[%s3203_s2 + $0x40] sm:$0xff]  ;;  %v82_v36 = vld [vmem:[%s3203_s2 + $0x48] sm:$0x1]  ;;  %vm2623_vm0 = vmmov 0   ;;  %s2627_s19 = smov 96  }
   0x6   :  { %2425 = vmatprep.subr.bf16.mxu0 %v2424_v9  ;;  %v170_v19 = vshra.s32 %v40_v13, 3  ;;  %v179_v21 = vrot.slane %v175_v8, %v2709_v14  ;;  %v42_v22 = vand.u32 7, %v40_v13  ;;  %v43_v23 = vadd.s32 1, %v41_v17  ;;  %v2520_v39 = vld [vmem:[%s3204_s3] sm:$0xff]   ;;  %v2521_v46 = vld [vmem:[%s3204_s3 + $0x8] sm:$0xff]   ;;  %2252 = vmatprep.mubr.msk.bf16.mxu1 %vm2623_vm0, %v2621_v37  ;;  %s2628_s0 = smov 64  }
   0x7   :  { %2427 = vmatpush3.bf16.msra.mxu0 %v2424_v9  ;;  %v2440_v38 = vpack.c.bf16 %v82_v36, %v81_v35  ;;  %2249 = vmatpush3.bf16.msra.mxu1 %v2520_v39  ;;  %v2777_v50 = vld [vmem:[%s3205_s7] sm:$0xff]  ;;  %vm511_vm7 = vcmask 130048   ;;  %s2629_s24 = smov 8   ;;  %s2630_s25 = smov 16  }
   0x8   :  { %2429 = vmatprep.subr.bf16.mxu0 %v2428_v18  ;;  %vm173_vm3 = vcmp.ne.s32.totalorder %v170_v19, %v171_v20  ;;  %v44_v25 = vadd.s32 1, %v42_v22  ;;  %vm2728_vm4 = vcmp.eq.s32.totalorder %v179_v21, 1  ;;  %v47_v29 = vsel %vm45_vm1, 0, %v43_v23  ;;  %2250 = vmatprep.subr.bf16.mxu1 %v2621_v37  ;;  %s2631_s26 = smov 24  }
   0x9   :  { %vm2735_vm5 = vmor %vm173_vm3, %vm2728_vm4  ;;  %v57_v31 = vadd.s32 64, %v47_v29  ;;  %vm221_vm1 = vcmask 261120   ;;  %v208_v51 = vrot.slane %v2777_v50, %v2709_v14  ;;  %v169_v19 = vshra.s32 %v2691_v5, 3 }
   0xa   :  { %v48_v32 = vsel %vm46_vm2, 0, %v44_v25  ;;  %vm293_vm2 = vcmask 64512  }
   0xb   :  { %2431 = vmatpush3.bf16.msra.mxu0 %v2428_v18  ;;  %v58_v33 = vadd.s32 64, %v48_v32  ;;  %60 = vperm.xlu0 %2458, %v57_v31   ;;  %vm172_vm3 = vcmp.ne.s32.totalorder %v169_v19, %v171_v20 }
   0xc   :  { %2433 = vmatprep.subr.bf16.mxu0 %v2432_v24  ;;  %2251 = vmatpush3.bf16.msra.mxu1 %v2521_v46  ;;  %vm2829_vm6 = vmor %vm172_vm3, %vm2728_vm4  ;;  %vm820_vm4 = vcmask 195584  }
   0xd   :  { %63 = vperm.xlu1 %2459, %v58_v33   ;;  %2256 = vmatprep.subr.bf16.mxu1 %v2621_v37 }
   0xf   :  { %2435 = vmatpush3.bf16.msra.mxu0 %v2432_v24 }
  0x10   :  { %2437 = vmatprep.subr.bf16.mxu0 %v2436_v34 }
  0x13   :  { %2439 = vmatpush3.bf16.msra.mxu0 %v2436_v34 }
  0x14   :  { %2442 = vmatprep.subr.msk.bf16.mxu0 %vm2441_vm8, %v2440_v38 }
  0x17   :  { %2445 = vmatpush3.bf16.msk.msra.mxu0 %vm2441_vm8, %v2440_v38  ;;  %vm1017_vm8 = vcmask 523264  }
  0x18   :  { %2268 = vmatprep.subr.bf16.mxu0 %v2621_v37 }
  0x81   :  { %v54_v41 = vpop.permute.xlu1 %53 }
  0x82   :  { %v51_v40 = vpop.permute.xlu0 %50  ;;  %vm56_vm12 = vcmp.eq.s32.totalorder %v2705_v12, %v54_v41 }
  0x83   :  { %vm55_vm9 = vcmp.eq.s32.totalorder %v2705_v12, %v51_v40 }
  0x8a   :  { %v61_v42 = vpop.permute.xlu0 %60 }
  0x8b   :  { %vm65_vm10 = vcmp.eq.s32.totalorder %v2705_v12, %v61_v42 }
  0x8c   :  { %v64_v43 = vpop.permute.xlu1 %63  ;;  %vm67_vm14 = vmor %vm55_vm9, %vm65_vm10 }
  0x8d   :  { %vm66_vm13 = vcmp.eq.s32.totalorder %v2705_v12, %v64_v43  ;;  %v2078_v44 = vsel %vm67_vm14, 1.0, %v2621_v37 }
  0x8e   :  { %vm68_vm15 = vmor %vm56_vm12, %vm66_vm13  ;;  %2245 = vmatprep.mubr.msk.f32.mxu0 %vm83_vm11, %v2078_v44 }
  0x8f   :  { %v2079_v45 = vsel %vm68_vm15, 1.0, %v2621_v37 }
  0x90   :  { %2246 = vmatmul.mubr.msk.f32.vlgmr.msra.gmra.mrb[0].mxu0 %vm83_vm11, %v2079_v45 }
  0x91   :  { %2270 = vmatprep.mubr.msk.bf16.mxu0 %vm2623_vm0, %v2621_v37 }
 0x163   :  { %v2765_v47 = vpop.f32.mrb[0].mxu0 }
 0x164   :  { %v2767_v48 = vpop.f32.mrb[1].mxu0 }
 0x165   :  { %v204_v49 = vpack.c.bf16 %v2765_v47, %v2767_v48 }
 0x167   :  { %2253 = vmatmul.mubr.msk.bf16.vlgmr.msra.gmra.mrb[0].mxu1 %vm221_vm1, %v204_v49 }
 0x168   :  { %2258 = vmatprep.mubr.msk.bf16.mxu1 %vm2623_vm0, %v2621_v37 }
 0x23a   :  { %v259_v52 = vpop.f32.mrb[0].mxu1 }
 0x23b   :  { %v2254_v53 = vpop.f32.mrb[1].mxu1  ;;  %v260_v55 = vadd.f32 %v259_v52, %v208_v51 }
 0x23c   :  { %v262_v54 = vpop.f32.mrb[2].mxu1 }
 0x23d   :  { %v263_v56 = vadd.f32 %v262_v54, %v208_v51  ;;  %v2255_v57 = vpop.f32.mrb[3].mxu1 }
 0x23f   :  { %v2465_v58 = vpack.i.bf16 %v263_v56, %v260_v55  ;;  %v2781_v59 = vpack.c.bf16 %v263_v56, %v260_v55 }
 0x241   :  { %2466 = vrot.lane.b32.xlu1 %v2465_v58, %s2624_s17  ;;  %2461 = vrot.lane.b32.xlu0 %v2465_v58, %s2625_s1 }
 0x245   :  { %2471 = vrot.lane.b32.xlu0 %v2465_v58, %s2626_s18  ;;  %291 = vrot.lane.b32.xlu1 %v2781_v59, %s2627_s19 }
 0x2b3   :  { %v2467_v60 = vpop.permute.xlu1 %2466  ;;  %v2462_v61 = vpop.permute.xlu0 %2461 }
 0x2b4   :  { %v2469_v62 = vunpack.i.h.bf16 %v2467_v60  ;;  %v2468_v63 = vunpack.i.l.bf16 %v2467_v60  ;;  %v2464_v0 = vunpack.i.h.bf16 %v2462_v61  ;;  %v2463_v1 = vunpack.i.l.bf16 %v2462_v61 }
 0x2b6   :  { %v2788_v2 = vpack.c.bf16 %v2469_v62, %v2468_v63  ;;  %v2790_v3 = vpack.c.bf16 %v2464_v0, %v2463_v1 }
 0x2b7   :  { %v2472_v4 = vpop.permute.xlu0 %2471  ;;  %v292_v6 = vpop.permute.xlu1 %291 }
 0x2b8   :  { %v2474_v7 = vunpack.i.h.bf16 %v2472_v4  ;;  %v2473_v8 = vunpack.i.l.bf16 %v2472_v4  ;;  %v298_v9 = vsel %vm293_vm2, %v292_v6, 0  ;;  %342 = vrot.lane.b32.xlu0 %v2790_v3, %s2627_s19  ;;  %392 = vrot.lane.b32.xlu1 %v2788_v2, %s2627_s19 }
 0x2b9   :  { %2257 = vmatpush3.bf16.xpose.msra.mxu1 %v298_v9 }
 0x2ba   :  { %v2797_v10 = vpack.c.bf16 %v2474_v7, %v2473_v8  ;;  %2262 = vmatprep.subr.bf16.mxu1 %v2621_v37 }
 0x2bc   :  { %442 = vrot.lane.b32.xlu0 %v2797_v10, %s2627_s19 }
 0x2c0   :  { %2259 = vmatmul.mubr.msk.bf16.vlgmr.msra.gmra.mrb[4].mxu1 %vm293_vm2, %v2781_v59 }
 0x2c1   :  { %2264 = vmatprep.mubr.msk.bf16.mxu1 %vm2623_vm0, %v2621_v37 }
 0x32a   :  { %v343_v11 = vpop.permute.xlu0 %342  ;;  %v393_v13 = vpop.permute.xlu1 %392 }
 0x32b   :  { %v348_v15 = vsel %vm293_vm2, %v343_v11, 0  ;;  %v398_v16 = vsel %vm293_vm2, %v393_v13, 0 }
 0x32c   :  { %2263 = vmatpush3.bf16.xpose.msra.mxu1 %v348_v15  ;;  %2269 = vmatpush3.bf16.xpose.msra.mxu0 %v398_v16 }
 0x32d   :  { %2274 = vmatprep.subr.bf16.mxu1 %v2621_v37  ;;  %2280 = vmatprep.subr.bf16.mxu0 %v2621_v37 }
 0x32e   :  { %v443_v17 = vpop.permute.xlu0 %442 }
 0x32f   :  { %v448_v18 = vsel %vm293_vm2, %v443_v17, 0 }
 0x333   :  { %2265 = vmatmul.mubr.msk.bf16.vlgmr.msra.gmra.mrb[8].mxu1 %vm293_vm2, %v2790_v3  ;;  %2271 = vmatmul.mubr.msk.bf16.vlgmr.msra.gmra.mrb[4].mxu0 %vm293_vm2, %v2788_v2 }
 0x334   :  { %2275 = vmatpush3.bf16.xpose.msra.mxu1 %v448_v18  ;;  %2276 = vmatprep.mubr.msk.bf16.mxu1 %vm2623_vm0, %v2621_v37 }
 0x335   :  { %2286 = vmatprep.subr.bf16.mxu1 %v2621_v37  ;;  %2282 = vmatprep.mubr.msk.bf16.mxu0 %vm2623_vm0, %v2621_v37 }
 0x33b   :  { %2277 = vmatmul.mubr.msk.bf16.vlgmr.msra.gmra.mrb[12].mxu1 %vm293_vm2, %v2797_v10 }
 0x33c   :  { %2288 = vmatprep.mubr.msk.bf16.mxu1 %vm2623_vm0, %v2621_v37 }
 0x393   :  { %v334_v22 = vpop.f32.mrb[4].mxu1 }
 0x394   :  { %v491_v23 = vmul.f32 0.35355338, %v334_v22  ;;  %v2260_v24 = vpop.f32.mrb[5].mxu1 }
 0x395   :  { %v337_v25 = vpop.f32.mrb[6].mxu1 }
 0x396   :  { %v492_v26 = vmul.f32 0.35355338, %v337_v25  ;;  %v2261_v27 = vpop.f32.mrb[7].mxu1  ;;  %v503_v29 = vsel %vm2829_vm6, -1e+09, %v491_v23 }
 0x397   :  { %v512_v31 = vsel %vm511_vm7, %v503_v29, -inf }
 0x398   :  { %513 = vmax.xlane.f32.xlu1 %v512_v31  ;;  %v504_v12 = vsel %vm2735_vm5, -1e+09, %v492_v26 }
 0x399   :  { %v515_v20 = vsel %vm511_vm7, %v504_v12, -inf }
 0x39a   :  { %516 = vmax.xlane.f32.xlu0 %v515_v20 }
 0x406   :  { %v384_v28 = vpop.f32.mrb[8].mxu1  ;;  %v434_v32 = vpop.f32.mrb[4].mxu0 }
 0x407   :  { %v493_v33 = vmul.f32 0.35355338, %v384_v28  ;;  %v2266_v34 = vpop.f32.mrb[9].mxu1  ;;  %v2272_v35 = vpop.f32.mrb[5].mxu0  ;;  %v495_v36 = vmul.f32 0.35355338, %v434_v32 }
 0x408   :  { %v387_v38 = vpop.f32.mrb[10].mxu1  ;;  %v437_v39 = vpop.f32.mrb[6].mxu0 }
 0x409   :  { %v494_v40 = vmul.f32 0.35355338, %v387_v38  ;;  %v496_v41 = vmul.f32 0.35355338, %v437_v39  ;;  %v2267_v42 = vpop.f32.mrb[11].mxu1  ;;  %v2273_v43 = vpop.f32.mrb[7].mxu0 }
 0x40a   :  { %v505_v44 = vsel %vm2829_vm6, -1e+09, %v493_v33  ;;  %v507_v51 = vsel %vm2829_vm6, -1e+09, %v495_v36 }
 0x40b   :  { %v518_v45 = vsel %vm511_vm7, %v505_v44, -inf  ;;  %v506_v46 = vsel %vm2735_vm5, -1e+09, %v494_v40  ;;  %v508_v52 = vsel %vm2735_vm5, -1e+09, %v496_v41  ;;  %v524_v55 = vsel %vm511_vm7, %v507_v51, -inf }
 0x40c   :  { %519 = vmax.xlane.f32.xlu0 %v518_v45  ;;  %v521_v49 = vsel %vm511_vm7, %v506_v46, -inf  ;;  %v527_v58 = vsel %vm511_vm7, %v508_v52, -inf }
 0x40d   :  { %522 = vmax.xlane.f32.xlu1 %v521_v49 }
 0x40e   :  { %v484_v53 = vpop.f32.mrb[12].mxu1 }
 0x40f   :  { %v497_v54 = vmul.f32 0.35355338, %v484_v53  ;;  %v2278_v56 = vpop.f32.mrb[13].mxu1 }
 0x410   :  { %525 = vmax.xlane.f32.xlu0 %v524_v55  ;;  %v487_v57 = vpop.f32.mrb[14].mxu1 }
 0x411   :  { %v498_v60 = vmul.f32 0.35355338, %v487_v57  ;;  %528 = vmax.xlane.f32.xlu1 %v527_v58  ;;  %v2279_v61 = vpop.f32.mrb[15].mxu1  ;;  %v509_v62 = vsel %vm2829_vm6, -1e+09, %v497_v54 }
 0x412   :  { %v530_v63 = vsel %vm511_vm7, %v509_v62, -inf }
 0x413   :  { %v510_v0 = vsel %vm2735_vm5, -1e+09, %v498_v60 }
 0x414   :  { %531 = vmax.xlane.f32.xlu0 %v530_v63  ;;  %v533_v1 = vsel %vm511_vm7, %v510_v0, -inf }
 0x415   :  { %534 = vmax.xlane.f32.xlu1 %v533_v1 }
 0x425   :  { %v514_v4 = vpop.xlane.xlu1 %513 }
 0x426   :  { %651 = vrot.lane.b32.xlu1 %v2790_v3, %s2628_s0  ;;  %v536_v7 = vsub.f32 %v503_v29, %v514_v4 }
 0x427   :  { %v517_v6 = vpop.xlane.xlu0 %516 }
 0x428   :  { %v537_v8 = vsub.f32 %v504_v12, %v517_v6  ;;  %v544_v9 = vmul.f32 1.442695, %v536_v7 }
 0x42a   :  { %604 = vrot.lane.b32.xlu0 %v2781_v59, %s2628_s0  ;;  %v546_v11 = vmul.f32 1.442695, %v537_v8  ;;  %2540 = vpow2.f32 %v544_v9 }
 0x42c   :  { %2542 = vpow2.f32 %v546_v11 }
 0x434   :  { %v2541_v13 = vpop.eup %2540 }
 0x435   :  { %v560_v16 = vsel %vm511_vm7, %v2541_v13, 0.0 }
 0x436   :  { %v2543_v15 = vpop.eup %2542 }
 0x437   :  { %v563_v17 = vsel %vm511_vm7, %v2543_v15, 0.0 }
 0x449   :  { %561 = vadd.xlane.f32.xlu0 %v560_v16 }
 0x44a   :  { %564 = vadd.xlane.f32.xlu1 %v563_v17 }
 0x499   :  { %v520_v3 = vpop.xlane.xlu0 %519 }
 0x49a   :  { %v538_v18 = vsub.f32 %v505_v44, %v520_v3  ;;  %v523_v19 = vpop.xlane.xlu1 %522 }
 0x49b   :  { %v539_v59 = vsub.f32 %v506_v46, %v523_v19 }
 0x49c   :  { %v548_v22 = vmul.f32 1.442695, %v538_v18 }
 0x49d   :  { %v550_v23 = vmul.f32 1.442695, %v539_v59  ;;  %v526_v24 = vpop.xlane.xlu0 %525 }
 0x49e   :  { %2544 = vpow2.f32 %v548_v22  ;;  %v540_v25 = vsub.f32 %v507_v51, %v526_v24  ;;  %v529_v26 = vpop.xlane.xlu1 %528 }
 0x49f   :  { %2546 = vpow2.f32 %v550_v23  ;;  %v541_v27 = vsub.f32 %v508_v52, %v529_v26 }
 0x4a0   :  { %v552_v29 = vmul.f32 1.442695, %v540_v25 }
 0x4a1   :  { %v554_v31 = vmul.f32 1.442695, %v541_v27  ;;  %v532_v12 = vpop.xlane.xlu0 %531 }
 0x4a2   :  { %2548 = vpow2.f32 %v552_v29  ;;  %v542_v20 = vsub.f32 %v509_v62, %v532_v12  ;;  %v535_v28 = vpop.xlane.xlu1 %534  ;;  %v2522_v29 = vld [vmem:[%s3206_s4] sm:$0xff]  }
 0x4a3   :  { %2550 = vpow2.f32 %v554_v31  ;;  %v543_v32 = vsub.f32 %v510_v0, %v535_v28 }
 0x4a4   :  { %v556_v33 = vmul.f32 1.442695, %v542_v20  ;;  %v2523_v20 = vld [vmem:[%s3206_s4 + $0x8] sm:$0xff]  }
 0x4a5   :  { %v558_v34 = vmul.f32 1.442695, %v543_v32  ;;  %v605_v35 = vpop.permute.xlu0 %604 }
 0x4a6   :  { %2552 = vpow2.f32 %v556_v33  ;;  %2281 = vmatpush3.bf16.msra.mxu0 %v605_v35  ;;  %v652_v36 = vpop.permute.xlu1 %651 }
 0x4a7   :  { %2554 = vpow2.f32 %v558_v34  ;;  %2287 = vmatpush3.bf16.msra.mxu1 %v652_v36  ;;  %2292 = vmatprep.subr.bf16.mxu0 %v2621_v37 }
 0x4a8   :  { %v2545_v38 = vpop.eup %2544  ;;  %2298 = vmatprep.subr.bf16.mxu1 %v2621_v37 }
 0x4a9   :  { %v2547_v39 = vpop.eup %2546  ;;  %v566_v40 = vsel %vm511_vm7, %v2545_v38, 0.0 }
 0x4aa   :  { %567 = vadd.xlane.f32.xlu0 %v566_v40  ;;  %v569_v41 = vsel %vm511_vm7, %v2547_v39, 0.0 }
 0x4ab   :  { %570 = vadd.xlane.f32.xlu1 %v569_v41 }
 0x4ac   :  { %v2549_v42 = vpop.eup %2548 }
 0x4ad   :  { %v2551_v43 = vpop.eup %2550  ;;  %v572_v44 = vsel %vm511_vm7, %v2549_v42, 0.0 }
 0x4ae   :  { %573 = vadd.xlane.f32.xlu0 %v572_v44  ;;  %v575_v45 = vsel %vm511_vm7, %v2551_v43, 0.0 }
 0x4af   :  { %576 = vadd.xlane.f32.xlu1 %v575_v45 }
 0x4b0   :  { %v2553_v46 = vpop.eup %2552 }
 0x4b1   :  { %v2555_v49 = vpop.eup %2554  ;;  %v578_v51 = vsel %vm511_vm7, %v2553_v46, 0.0 }
 0x4b2   :  { %579 = vadd.xlane.f32.xlu0 %v578_v51  ;;  %v581_v52 = vsel %vm511_vm7, %v2555_v49, 0.0 }
 0x4b3   :  { %582 = vadd.xlane.f32.xlu1 %v581_v52 }
 0x4c4   :  { %698 = vrot.lane.b32.xlu1 %v2788_v2, %s2628_s0 }
 0x4c8   :  { %745 = vrot.lane.b32.xlu0 %v2797_v10, %s2628_s0 }
 0x4d6   :  { %v562_v53 = vpop.xlane.xlu0 %561 }
 0x4d7   :  { %2556 = vrcp.f32 %v562_v53  ;;  %v565_v54 = vpop.xlane.xlu1 %564 }
 0x4d8   :  { %2558 = vrcp.f32 %v565_v54 }
 0x4e1   :  { %v2557_v55 = vpop.eup %2556 }
 0x4e2   :  { %v2559_v56 = vpop.eup %2558  ;;  %v592_v57 = vmul.f32 %v2557_v55, %v2541_v13 }
 0x4e3   :  { %v593_v58 = vmul.f32 %v2559_v56, %v2543_v15 }
 0x4e5   :  { %v600_v60 = vpack.c.bf16 %v593_v58, %v592_v57 }
 0x4e7   :  { %2283 = vmatmul.mubr.msk.bf16.vlgmr.msra.gmra.mrb[8].mxu0 %vm511_vm7, %v600_v60 }
 0x4e8   :  { %2294 = vmatprep.mubr.msk.bf16.mxu0 %vm2623_vm0, %v2621_v37 }
 0x537   :  { %v568_v61 = vpop.xlane.xlu0 %567 }
 0x538   :  { %2560 = vrcp.f32 %v568_v61  ;;  %v571_v2 = vpop.xlane.xlu1 %570 }
 0x539   :  { %2562 = vrcp.f32 %v571_v2 }
 0x53b   :  { %v574_v62 = vpop.xlane.xlu0 %573 }
 0x53c   :  { %2564 = vrcp.f32 %v574_v62  ;;  %v577_v10 = vpop.xlane.xlu1 %576 }
 0x53d   :  { %2566 = vrcp.f32 %v577_v10 }
 0x53f   :  { %v580_v63 = vpop.xlane.xlu0 %579 }
 0x540   :  { %2568 = vrcp.f32 %v580_v63  ;;  %v583_v0 = vpop.xlane.xlu1 %582  ;;  %v826_v63 = vsub.s32 1, %v2691_v5 }
 0x541   :  { %2570 = vrcp.f32 %v583_v0 }
 0x542   :  { %v2561_v1 = vpop.eup %2560  ;;  %v827_v0 = vrot.slane %v2777_v50, %v826_v63 }
 0x543   :  { %v2563_v4 = vpop.eup %2562  ;;  %v594_v6 = vmul.f32 %v2561_v1, %v2545_v38  ;;  %v746_v17 = vpop.permute.xlu0 %745 }
 0x544   :  { %v595_v7 = vmul.f32 %v2563_v4, %v2547_v39  ;;  %v699_v8 = vpop.permute.xlu1 %698 }
 0x545   :  { %2293 = vmatpush3.bf16.msra.mxu0 %v699_v8 }
 0x546   :  { %v2565_v9 = vpop.eup %2564  ;;  %v601_v11 = vpack.c.bf16 %v595_v7, %v594_v6  ;;  %2304 = vmatprep.subr.bf16.mxu0 %v2621_v37 }
 0x547   :  { %v2567_v13 = vpop.eup %2566  ;;  %v596_v15 = vmul.f32 %v2565_v9, %v2549_v42 }
 0x548   :  { %v597_v16 = vmul.f32 %v2567_v13, %v2551_v43  ;;  %2289 = vmatmul.mubr.msk.bf16.vlgmr.msra.gmra.mrb[16].mxu1 %vm511_vm7, %v601_v11 }
 0x549   :  { %2299 = vmatpush3.bf16.msra.mxu1 %v746_v17  ;;  %2300 = vmatprep.mubr.msk.bf16.mxu1 %vm2623_vm0, %v2621_v37 }
 0x54a   :  { %v2569_v3 = vpop.eup %2568  ;;  %v602_v18 = vpack.c.bf16 %v597_v16, %v596_v15  ;;  %2312 = vmatprep.subr.bf16.mxu1 %v2621_v37 }
 0x54b   :  { %v2571_v19 = vpop.eup %2570  ;;  %v598_v59 = vmul.f32 %v2569_v3, %v2553_v46 }
 0x54c   :  { %v599_v22 = vmul.f32 %v2571_v19, %v2555_v49  ;;  %2295 = vmatmul.mubr.msk.bf16.vlgmr.msra.gmra.mrb[12].mxu0 %vm511_vm7, %v602_v18 }
 0x54d   :  { %2308 = vmatprep.mubr.msk.bf16.mxu0 %vm2623_vm0, %v2621_v37  ;;  %2305 = vmatpush3.bf16.msra.mxu0 %v2522_v29  ;;  %v2527_v29 = vld [vmem:[%s3208_s6 + $0x8] sm:$0xff]  }
 0x54e   :  { %v603_v23 = vpack.c.bf16 %v599_v22, %v598_v59  ;;  %2306 = vmatprep.subr.bf16.mxu0 %v2621_v37 }
 0x550   :  { %2301 = vmatmul.mubr.msk.bf16.vlgmr.msra.gmra.mrb[20].mxu1 %vm511_vm7, %v603_v23 }
 0x551   :  { %2316 = vmatprep.mubr.msk.bf16.mxu1 %vm2623_vm0, %v2621_v37  ;;  %2307 = vmatpush3.bf16.msra.mxu0 %v2523_v20 }
 0x552   :  { %2320 = vmatprep.subr.bf16.mxu0 %v2621_v37 }
 0x5ba   :  { %v644_v24 = vpop.f32.mrb[8].mxu0 }
 0x5bb   :  { %v2284_v25 = vpop.f32.mrb[9].mxu0 }
 0x5bc   :  { %v647_v26 = vpop.f32.mrb[10].mxu0 }
 0x5bd   :  { %v2285_v27 = vpop.f32.mrb[11].mxu0 }
 0x5be   :  { %v2526_v27 = vld [vmem:[%s3208_s6] sm:$0xff]  }
 0x61b   :  { %v691_v31 = vpop.f32.mrb[16].mxu1 }
 0x61c   :  { %v2290_v12 = vpop.f32.mrb[17].mxu1 }
 0x61d   :  { %v694_v28 = vpop.f32.mrb[18].mxu1 }
 0x61e   :  { %v2475_v32 = vpack.i.bf16 %v694_v28, %v691_v31  ;;  %v2291_v33 = vpop.f32.mrb[19].mxu1 }
 0x61f   :  { %v738_v34 = vpop.f32.mrb[12].mxu0 }
 0x620   :  { %v2296_v35 = vpop.f32.mrb[13].mxu0  ;;  %2476 = vrot.lane.b32.xlu1 %v2475_v32, %s2629_s24 }
 0x621   :  { %v741_v36 = vpop.f32.mrb[14].mxu0 }
 0x622   :  { %v2480_v38 = vpack.i.bf16 %v741_v36, %v738_v34  ;;  %v2297_v39 = vpop.f32.mrb[15].mxu0  ;;  %v915_v34 = vsub.s32 2, %v2691_v5 }
 0x623   :  { %v785_v40 = vpop.f32.mrb[20].mxu1  ;;  %v921_v39 = vsub.s32 3, %v2691_v5 }
 0x624   :  { %2481 = vrot.lane.b32.xlu0 %v2480_v38, %s2630_s25  ;;  %v2302_v41 = vpop.f32.mrb[21].mxu1  ;;  %v916_v36 = vrot.slane %v2777_v50, %v915_v34 }
 0x625   :  { %v788_v42 = vpop.f32.mrb[22].mxu1 }
 0x626   :  { %v2485_v43 = vpack.i.bf16 %v788_v42, %v785_v40  ;;  %v2303_v44 = vpop.f32.mrb[23].mxu1 }
 0x628   :  { %2486 = vrot.lane.b32.xlu1 %v2485_v43, %s2631_s26  ;;  %v922_v43 = vrot.slane %v2777_v50, %v921_v39 }
 0x692   :  { %v2477_v45 = vpop.permute.xlu1 %2476 }
 0x693   :  { %v2479_v49 = vunpack.i.h.bf16 %v2477_v45  ;;  %v2478_v51 = vunpack.i.l.bf16 %v2477_v45 }
 0x695   :  { %v817_v55 = vsel %vm293_vm2, %v647_v26, %v2479_v49  ;;  %v816_v56 = vsel %vm293_vm2, %v644_v24, %v2478_v51  ;;  %v2525_v26 = vld [vmem:[%s3207_s5 + $0x8] sm:$0xff]   ;;  %v2528_v51 = vld [vmem:[%s3208_s6 + $0x10] sm:$0xff]  }
 0x696   :  { %v2482_v46 = vpop.permute.xlu0 %2481 }
 0x697   :  { %v2484_v52 = vunpack.i.h.bf16 %v2482_v46  ;;  %v2483_v53 = vunpack.i.l.bf16 %v2482_v46 }
 0x699   :  { %v818_v60 = vsel %vm511_vm7, %v816_v56, %v2483_v53  ;;  %v819_v61 = vsel %vm511_vm7, %v817_v55, %v2484_v52  ;;  %v2529_v52 = vld [vmem:[%s3208_s6 + $0x18] sm:$0xff]   ;;  %v928_v53 = vsub.s32 4, %v2691_v5 }
 0x69a   :  { %v2487_v54 = vpop.permute.xlu1 %2486 }
 0x69b   :  { %v2489_v57 = vunpack.i.h.bf16 %v2487_v54  ;;  %v2488_v58 = vunpack.i.l.bf16 %v2487_v54  ;;  %v929_v54 = vrot.slane %v2777_v50, %v928_v53 }
 0x69d   :  { %v822_v2 = vsel %vm820_vm4, %v819_v61, %v2489_v57  ;;  %v821_v62 = vsel %vm820_vm4, %v818_v60, %v2488_v58 }
 0x69e   :  { %v823_v10 = vpack.c.bf16 %v822_v2, %v821_v62 }
 0x6a0   :  { %2309 = vmatmul.mubr.msk.bf16.vlgmr.msra.gmra.mrb[16].mxu0 %vm221_vm1, %v823_v10 }
 0x6a1   :  { %2328 = vmatprep.mubr.msk.bf16.mxu0 %vm2623_vm0, %v2621_v37  ;;  %2321 = vmatpush3.bf16.msra.mxu0 %v2526_v27  ;;  %v2531_v27 = vld [vmem:[%s3204_s3 + $0x18] sm:$0xff]  }
 0x6a2   :  { %2322 = vmatprep.subr.bf16.mxu0 %v2621_v37 }
 0x6a5   :  { %2323 = vmatpush3.bf16.msra.mxu0 %v2527_v29 }
 0x6a6   :  { %2324 = vmatprep.subr.bf16.mxu0 %v2621_v37 }
 0x6a9   :  { %2325 = vmatpush3.bf16.msra.mxu0 %v2528_v51 }
 0x6aa   :  { %2326 = vmatprep.subr.bf16.mxu0 %v2621_v37 }
 0x6ad   :  { %2327 = vmatpush3.bf16.msra.mxu0 %v2529_v52  ;;  %v2997_v52 = vld [vmem:[%s3205_s7 + $0x8] sm:$0xff] }
 0x6ae   :  { %2346 = vmatprep.subr.bf16.mxu0 %v2621_v37 }
 0x773   :  { %v877_v1 = vpop.f32.mrb[16].mxu0 }
 0x774   :  { %v878_v4 = vadd.f32 %v877_v1, %v827_v0  ;;  %v2310_v6 = vpop.f32.mrb[17].mxu0 }
 0x775   :  { %v880_v7 = vpop.f32.mrb[18].mxu0 }
 0x776   :  { %v881_v8 = vadd.f32 %v880_v7, %v827_v0  ;;  %v2311_v9 = vpop.f32.mrb[19].mxu0  ;;  %v884_v11 = vadd.f32 %v878_v4, %v2767_v48  ;;  %v991_v0 = vsub.s32 5, %v2691_v5 }
 0x778   :  { %v886_v13 = vsel %vm221_vm1, %v884_v11, 0.0  ;;  %v885_v15 = vadd.f32 %v2765_v47, %v881_v8  ;;  %v2524_v47 = vld [vmem:[%s3207_s5] sm:$0xff]   ;;  %v992_v1 = vrot.slane %v2777_v50, %v991_v0 }
 0x779   :  { %887 = vadd.xlane.f32.xlu0 %v886_v13  ;;  %2313 = vmatpush3.bf16.msra.mxu1 %v2524_v47 }
 0x77a   :  { %v889_v16 = vsel %vm221_vm1, %v885_v15, 0.0  ;;  %2314 = vmatprep.subr.bf16.mxu1 %v2621_v37 }
 0x77b   :  { %890 = vadd.xlane.f32.xlu1 %v889_v16 }
 0x77d   :  { %2315 = vmatpush3.bf16.msra.mxu1 %v2525_v26  ;;  %v2530_v26 = vld [vmem:[%s3204_s3 + $0x10] sm:$0xff]  }
 0x77e   :  { %2332 = vmatprep.subr.bf16.mxu1 %v2621_v37 }
 0x806   :  { %v888_v17 = vpop.xlane.xlu0 %887 }
 0x807   :  { %v893_v3 = vmul.f32 0.03125, %v888_v17 }
 0x808   :  { %v891_v18 = vpop.xlane.xlu1 %890 }
 0x809   :  { %v895_v19 = vsub.f32 %v884_v11, %v893_v3  ;;  %v894_v59 = vmul.f32 0.03125, %v891_v18 }
 0x80b   :  { %v896_v22 = vsub.f32 %v885_v15, %v894_v59  ;;  %v897_v23 = vmul.f32 %v895_v19, %v895_v19 }
 0x80d   :  { %v899_v24 = vsel %vm221_vm1, %v897_v23, 0.0  ;;  %v898_v25 = vmul.f32 %v896_v22, %v896_v22 }
 0x80e   :  { %900 = vadd.xlane.f32.xlu0 %v899_v24 }
 0x80f   :  { %v902_v48 = vsel %vm221_vm1, %v898_v25, 0.0 }
 0x812   :  { %903 = vadd.xlane.f32.xlu0 %v902_v48 }
 0x89b   :  { %v901_v31 = vpop.xlane.xlu0 %900 }
 0x89c   :  { %v905_v12 = vmul.f32 0.03125, %v901_v31 }
 0x89e   :  { %v907_v20 = vadd.f32 1e-06, %v905_v12 }
 0x89f   :  { %v904_v28 = vpop.xlane.xlu0 %903 }
 0x8a0   :  { %2572 = vrsqrt.f32 %v907_v20  ;;  %v906_v32 = vmul.f32 0.03125, %v904_v28 }
 0x8a2   :  { %v908_v33 = vadd.f32 1e-06, %v906_v32 }
 0x8a4   :  { %2574 = vrsqrt.f32 %v908_v33  ;;  %v1092_v33 = vsub.s32 6, %v2691_v5 }
 0x8aa   :  { %v2573_v35 = vpop.eup %2572 }
 0x8ab   :  { %v911_v38 = vmul.f32 %v2573_v35, %v895_v19  ;;  %v1093_v35 = vrot.slane %v2777_v50, %v1092_v33 }
 0x8ad   :  { %v917_v41 = vmul.f32 %v916_v36, %v911_v38 }
 0x8ae   :  { %v2575_v40 = vpop.eup %2574 }
 0x8af   :  { %v912_v42 = vmul.f32 %v2575_v40, %v896_v22  ;;  %v923_v45 = vadd.f32 %v922_v43, %v917_v41 }
 0x8b1   :  { %v918_v44 = vmul.f32 %v916_v36, %v912_v42  ;;  %v1098_v36 = vsub.s32 7, %v2691_v5 }
 0x8b3   :  { %v924_v46 = vadd.f32 %v922_v43, %v918_v44  ;;  %v1099_v44 = vrot.slane %v2777_v50, %v1098_v36  ;;  %v1132_v50 = vrot.slane %v2997_v52, %v2709_v14 }
 0x8b5   :  { %v925_v49 = vpack.c.bf16 %v924_v46, %v923_v45 }
 0x8b7   :  { %2317 = vmatmul.mubr.msk.bf16.vlgmr.msra.gmra.mrb[24].mxu1 %vm221_vm1, %v925_v49 }
 0x8b8   :  { %2336 = vmatprep.mubr.msk.bf16.mxu1 %vm2623_vm0, %v2621_v37  ;;  %2333 = vmatpush3.bf16.msra.mxu1 %v2530_v26 }
 0x8b9   :  { %2334 = vmatprep.subr.bf16.mxu1 %v2621_v37 }
 0x8bc   :  { %2335 = vmatpush3.bf16.msra.mxu1 %v2531_v27 }
 0x8bd   :  { %2340 = vmatprep.subr.bf16.mxu1 %v2621_v37 }
 0x98a   :  { %v979_v55 = vpop.f32.mrb[24].mxu1 }
 0x98b   :  { %v980_v56 = vadd.f32 %v979_v55, %v929_v54  ;;  %v2318_v57 = vpop.f32.mrb[25].mxu1 }
 0x98c   :  { %v982_v58 = vpop.f32.mrb[26].mxu1 }
 0x98d   :  { %v983_v60 = vadd.f32 %v982_v58, %v929_v54  ;;  %v2319_v61 = vpop.f32.mrb[27].mxu1  ;;  %v986_v2 = vmax.f32 %v980_v56, 0.0 }
 0x98f   :  { %v987_v62 = vmax.f32 %v983_v60, 0.0 }
 0x991   :  { %v988_v10 = vpack.c.bf16 %v987_v62, %v986_v2 }
 0x993   :  { %2329 = vmatmul.mubr.msk.bf16.vlgmr.msra.gmra.mrb[20].mxu0 %vm1017_vm8, %v988_v10 }
 0x994   :  { %2348 = vmatprep.mubr.msk.bf16.mxu0 %vm2623_vm0, %v2621_v37 }
 0xa66   :  { %v1055_v4 = vpop.f32.mrb[20].mxu0 }
 0xa67   :  { %v1056_v6 = vadd.f32 %v1055_v4, %v992_v1  ;;  %v2330_v7 = vpop.f32.mrb[21].mxu0 }
 0xa68   :  { %v1058_v8 = vpop.f32.mrb[22].mxu0 }
 0xa69   :  { %v1059_v9 = vadd.f32 %v1058_v8, %v992_v1  ;;  %v2331_v11 = vpop.f32.mrb[23].mxu0  ;;  %v1062_v13 = vadd.f32 %v1056_v6, %v923_v45 }
 0xa6b   :  { %v1064_v15 = vsel %vm221_vm1, %v1062_v13, 0.0  ;;  %v1063_v16 = vadd.f32 %v1059_v9, %v924_v46 }
 0xa6c   :  { %1065 = vadd.xlane.f32.xlu1 %v1064_v15 }
 0xa6d   :  { %v1067_v17 = vsel %vm221_vm1, %v1063_v16, 0.0 }
 0xa6e   :  { %1068 = vadd.xlane.f32.xlu0 %v1067_v17 }
 0xaf9   :  { %v1066_v3 = vpop.xlane.xlu1 %1065 }
 0xafa   :  { %v1070_v18 = vmul.f32 0.03125, %v1066_v3 }
 0xafb   :  { %v1069_v19 = vpop.xlane.xlu0 %1068 }
 0xafc   :  { %v1072_v59 = vsub.f32 %v1062_v13, %v1070_v18  ;;  %v1071_v22 = vmul.f32 0.03125, %v1069_v19 }
 0xafe   :  { %v1073_v23 = vsub.f32 %v1063_v16, %v1071_v22  ;;  %v1074_v24 = vmul.f32 %v1072_v59, %v1072_v59 }
 0xb00   :  { %v1076_v25 = vsel %vm221_vm1, %v1074_v24, 0.0  ;;  %v1075_v48 = vmul.f32 %v1073_v23, %v1073_v23 }
 0xb01   :  { %1077 = vadd.xlane.f32.xlu1 %v1076_v25 }
 0xb02   :  { %v1079_v47 = vsel %vm221_vm1, %v1075_v48, 0.0 }
 0xb03   :  { %1080 = vadd.xlane.f32.xlu0 %v1079_v47 }
 0xb8e   :  { %v1078_v29 = vpop.xlane.xlu1 %1077 }
 0xb8f   :  { %v1082_v31 = vmul.f32 0.03125, %v1078_v29 }
 0xb90   :  { %v1081_v12 = vpop.xlane.xlu0 %1080 }
 0xb91   :  { %v1084_v20 = vadd.f32 1e-06, %v1082_v31  ;;  %v1083_v28 = vmul.f32 0.03125, %v1081_v12 }
 0xb93   :  { %2576 = vrsqrt.f32 %v1084_v20  ;;  %v1085_v32 = vadd.f32 1e-06, %v1083_v28 }
 0xb95   :  { %2578 = vrsqrt.f32 %v1085_v32 }
 0xb9d   :  { %v2577_v38 = vpop.eup %2576 }
 0xb9e   :  { %v1088_v40 = vmul.f32 %v2577_v38, %v1072_v59 }
 0xb9f   :  { %v2579_v41 = vpop.eup %2578 }
 0xba0   :  { %v1094_v42 = vmul.f32 %v1093_v35, %v1088_v40  ;;  %v1089_v43 = vmul.f32 %v2579_v41, %v1073_v23 }
 0xba2   :  { %v1095_v45 = vmul.f32 %v1093_v35, %v1089_v43  ;;  %v2985_v46 = vadd.f32 %v1099_v44, %v1094_v42 }
 0xba4   :  { %v2987_v49 = vadd.f32 %v1099_v44, %v1095_v45 }
 0xba6   :  { %v1128_v51 = vpack.c.bf16 %v2987_v49, %v2985_v46 }
 0xba8   :  { %2337 = vmatmul.mubr.msk.bf16.vlgmr.msra.gmra.mrb[28].mxu1 %vm221_vm1, %v1128_v51 }
 0xba9   :  { %2342 = vmatprep.mubr.msk.bf16.mxu1 %vm2623_vm0, %v2621_v37 }
 0xc7b   :  { %v1182_v54 = vpop.f32.mrb[28].mxu1 }
 0xc7c   :  { %v2338_v55 = vpop.f32.mrb[29].mxu1  ;;  %v1183_v57 = vadd.f32 %v1182_v54, %v1132_v50 }
 0xc7d   :  { %v1185_v56 = vpop.f32.mrb[30].mxu1 }
 0xc7e   :  { %v1186_v58 = vadd.f32 %v1185_v56, %v1132_v50  ;;  %v2339_v60 = vpop.f32.mrb[31].mxu1 }
 0xc80   :  { %v2495_v61 = vpack.i.bf16 %v1186_v58, %v1183_v57  ;;  %v3001_v2 = vpack.c.bf16 %v1186_v58, %v1183_v57 }
 0xc82   :  { %2496 = vrot.lane.b32.xlu0 %v2495_v61, %s2624_s17  ;;  %2491 = vrot.lane.b32.xlu1 %v2495_v61, %s2625_s1 }
 0xc86   :  { %2501 = vrot.lane.b32.xlu1 %v2495_v61, %s2626_s18 }
 0xc8a   :  { %1214 = vrot.lane.b32.xlu1 %v3001_v2, %s2627_s19 }
 0xcf4   :  { %v2497_v62 = vpop.permute.xlu0 %2496  ;;  %v2492_v14 = vpop.permute.xlu1 %2491 }
 0xcf5   :  { %v2499_v10 = vunpack.i.h.bf16 %v2497_v62  ;;  %v2498_v1 = vunpack.i.l.bf16 %v2497_v62  ;;  %v2494_v4 = vunpack.i.h.bf16 %v2492_v14  ;;  %v2493_v6 = vunpack.i.l.bf16 %v2492_v14 }
 0xcf7   :  { %v3008_v7 = vpack.c.bf16 %v2499_v10, %v2498_v1  ;;  %v3010_v8 = vpack.c.bf16 %v2494_v4, %v2493_v6 }
 0xcf8   :  { %v2502_v9 = vpop.permute.xlu1 %2501 }
 0xcf9   :  { %v2504_v11 = vunpack.i.h.bf16 %v2502_v9  ;;  %v2503_v13 = vunpack.i.l.bf16 %v2502_v9  ;;  %1264 = vrot.lane.b32.xlu0 %v3010_v8, %s2627_s19  ;;  %1314 = vrot.lane.b32.xlu1 %v3008_v7, %s2627_s19 }
 0xcfb   :  { %v3016_v15 = vpack.c.bf16 %v2504_v11, %v2503_v13 }
 0xcfc   :  { %v1215_v16 = vpop.permute.xlu1 %1214 }
 0xcfd   :  { %v1220_v17 = vsel %vm293_vm2, %v1215_v16, 0  ;;  %1364 = vrot.lane.b32.xlu0 %v3016_v15, %s2627_s19 }
 0xcfe   :  { %2341 = vmatpush3.bf16.xpose.msra.mxu1 %v1220_v17 }
 0xcff   :  { %2352 = vmatprep.subr.bf16.mxu1 %v2621_v37 }
 0xd05   :  { %2343 = vmatmul.mubr.msk.bf16.vlgmr.msra.gmra.mrb[32].mxu1 %vm293_vm2, %v3001_v2 }
 0xd06   :  { %2354 = vmatprep.mubr.msk.bf16.mxu1 %vm2623_vm0, %v2621_v37 }
 0xd6b   :  { %v1265_v3 = vpop.permute.xlu0 %1264  ;;  %v1315_v18 = vpop.permute.xlu1 %1314 }
 0xd6c   :  { %v1270_v19 = vsel %vm293_vm2, %v1265_v3, 0  ;;  %v1320_v59 = vsel %vm293_vm2, %v1315_v18, 0 }
 0xd6d   :  { %2347 = vmatpush3.bf16.xpose.msra.mxu0 %v1270_v19  ;;  %2353 = vmatpush3.bf16.xpose.msra.mxu1 %v1320_v59 }
 0xd6e   :  { %2358 = vmatprep.subr.bf16.mxu0 %v2621_v37  ;;  %2364 = vmatprep.subr.bf16.mxu1 %v2621_v37 }
 0xd6f   :  { %v1365_v22 = vpop.permute.xlu0 %1364 }
 0xd70   :  { %v1370_v23 = vsel %vm293_vm2, %v1365_v22, 0 }
 0xd74   :  { %2349 = vmatmul.mubr.msk.bf16.vlgmr.msra.gmra.mrb[24].mxu0 %vm293_vm2, %v3010_v8  ;;  %2355 = vmatmul.mubr.msk.bf16.vlgmr.msra.gmra.mrb[36].mxu1 %vm293_vm2, %v3008_v7 }
 0xd75   :  { %2359 = vmatpush3.bf16.xpose.msra.mxu0 %v1370_v23  ;;  %2360 = vmatprep.mubr.msk.bf16.mxu0 %vm2623_vm0, %v2621_v37 }
 0xd76   :  { %2370 = vmatprep.subr.bf16.mxu0 %v2621_v37  ;;  %2366 = vmatprep.mubr.msk.bf16.mxu1 %vm2623_vm0, %v2621_v37 }
 0xd7c   :  { %2361 = vmatmul.mubr.msk.bf16.vlgmr.msra.gmra.mrb[28].mxu0 %vm293_vm2, %v3016_v15 }
 0xd7d   :  { %2372 = vmatprep.mubr.msk.bf16.mxu0 %vm2623_vm0, %v2621_v37 }
 0xdd8   :  { %v1256_v24 = vpop.f32.mrb[32].mxu1 }
 0xdd9   :  { %v1413_v25 = vmul.f32 0.35355338, %v1256_v24  ;;  %v2344_v48 = vpop.f32.mrb[33].mxu1 }
 0xdda   :  { %v1259_v47 = vpop.f32.mrb[34].mxu1 }
 0xddb   :  { %v1414_v26 = vmul.f32 0.35355338, %v1259_v47  ;;  %v2345_v27 = vpop.f32.mrb[35].mxu1  ;;  %v1421_v29 = vsel %vm2829_vm6, -1e+09, %v1413_v25 }
 0xddc   :  { %v1429_v31 = vsel %vm511_vm7, %v1421_v29, -inf }
 0xddd   :  { %1430 = vmax.xlane.f32.xlu1 %v1429_v31  ;;  %v1422_v12 = vsel %vm2735_vm5, -1e+09, %v1414_v26 }
 0xdde   :  { %v1432_v20 = vsel %vm511_vm7, %v1422_v12, -inf }
 0xddf   :  { %1433 = vmax.xlane.f32.xlu0 %v1432_v20 }
 0xe47   :  { %v1306_v28 = vpop.f32.mrb[24].mxu0  ;;  %v1356_v32 = vpop.f32.mrb[36].mxu1 }
 0xe48   :  { %v1415_v35 = vmul.f32 0.35355338, %v1306_v28  ;;  %v2350_v38 = vpop.f32.mrb[25].mxu0  ;;  %v2356_v40 = vpop.f32.mrb[37].mxu1  ;;  %v1417_v41 = vmul.f32 0.35355338, %v1356_v32 }
 0xe49   :  { %v1309_v42 = vpop.f32.mrb[26].mxu0  ;;  %v1359_v43 = vpop.f32.mrb[38].mxu1 }
 0xe4a   :  { %v1416_v44 = vmul.f32 0.35355338, %v1309_v42  ;;  %v1418_v45 = vmul.f32 0.35355338, %v1359_v43  ;;  %v2351_v51 = vpop.f32.mrb[27].mxu0  ;;  %v2357_v50 = vpop.f32.mrb[39].mxu1 }
 0xe4b   :  { %v1423_v54 = vsel %vm2829_vm6, -1e+09, %v1415_v35  ;;  %v1425_v58 = vsel %vm2829_vm6, -1e+09, %v1417_v41 }
 0xe4c   :  { %v1435_v55 = vsel %vm511_vm7, %v1423_v54, -inf  ;;  %v1424_v56 = vsel %vm2735_vm5, -1e+09, %v1416_v44  ;;  %v1426_v60 = vsel %vm2735_vm5, -1e+09, %v1418_v45  ;;  %v1441_v10 = vsel %vm511_vm7, %v1425_v58, -inf }
 0xe4d   :  { %1436 = vmax.xlane.f32.xlu0 %v1435_v55  ;;  %v1438_v57 = vsel %vm511_vm7, %v1424_v56, -inf  ;;  %v1444_v4 = vsel %vm511_vm7, %v1426_v60, -inf }
 0xe4e   :  { %1439 = vmax.xlane.f32.xlu1 %v1438_v57 }
 0xe4f   :  { %v1406_v61 = vpop.f32.mrb[28].mxu0 }
 0xe50   :  { %v1419_v62 = vmul.f32 0.35355338, %v1406_v61  ;;  %v2362_v14 = vpop.f32.mrb[29].mxu0 }
 0xe51   :  { %1442 = vmax.xlane.f32.xlu0 %v1441_v10  ;;  %v1409_v1 = vpop.f32.mrb[30].mxu0 }
 0xe52   :  { %v1420_v6 = vmul.f32 0.35355338, %v1409_v1  ;;  %v2363_v9 = vpop.f32.mrb[31].mxu0  ;;  %1445 = vmax.xlane.f32.xlu1 %v1444_v4  ;;  %v1427_v11 = vsel %vm2829_vm6, -1e+09, %v1419_v62 }
 0xe53   :  { %v1447_v13 = vsel %vm511_vm7, %v1427_v11, -inf }
 0xe54   :  { %v1428_v16 = vsel %vm2735_vm5, -1e+09, %v1420_v6 }
 0xe55   :  { %1448 = vmax.xlane.f32.xlu0 %v1447_v13  ;;  %v1450_v17 = vsel %vm511_vm7, %v1428_v16, -inf }
 0xe56   :  { %1451 = vmax.xlane.f32.xlu1 %v1450_v17 }
 0xe67   :  { %1568 = vrot.lane.b32.xlu1 %v3010_v8, %s2628_s0 }
 0xe6a   :  { %v1431_v3 = vpop.xlane.xlu1 %1430 }
 0xe6b   :  { %1521 = vrot.lane.b32.xlu0 %v3001_v2, %s2628_s0  ;;  %v1453_v19 = vsub.f32 %v1421_v29, %v1431_v3 }
 0xe6c   :  { %v1434_v18 = vpop.xlane.xlu0 %1433 }
 0xe6d   :  { %v1454_v21 = vsub.f32 %v1422_v12, %v1434_v18  ;;  %v1461_v59 = vmul.f32 1.442695, %v1453_v19 }
 0xe6f   :  { %v1463_v22 = vmul.f32 1.442695, %v1454_v21  ;;  %2580 = vpow2.f32 %v1461_v59 }
 0xe71   :  { %2582 = vpow2.f32 %v1463_v22 }
 0xe79   :  { %v2581_v30 = vpop.eup %2580 }
 0xe7a   :  { %v1477_v24 = vsel %vm511_vm7, %v2581_v30, 0.0 }
 0xe7b   :  { %v2583_v23 = vpop.eup %2582 }
 0xe7c   :  { %v1480_v25 = vsel %vm511_vm7, %v2583_v23, 0.0 }
 0xe8a   :  { %1478 = vadd.xlane.f32.xlu0 %v1477_v24 }
 0xe8b   :  { %1481 = vadd.xlane.f32.xlu1 %v1480_v25 }
 0xeda   :  { %v1437_v8 = vpop.xlane.xlu0 %1436 }
 0xedb   :  { %v1455_v48 = vsub.f32 %v1423_v54, %v1437_v8  ;;  %v1440_v47 = vpop.xlane.xlu1 %1439 }
 0xedc   :  { %v1456_v2 = vsub.f32 %v1424_v56, %v1440_v47 }
 0xedd   :  { %v1465_v26 = vmul.f32 1.442695, %v1455_v48 }
 0xede   :  { %v1467_v27 = vmul.f32 1.442695, %v1456_v2  ;;  %v1443_v29 = vpop.xlane.xlu0 %1442 }
 0xedf   :  { %2584 = vpow2.f32 %v1465_v26  ;;  %v1457_v31 = vsub.f32 %v1425_v58, %v1443_v29  ;;  %v1446_v12 = vpop.xlane.xlu1 %1445 }
 0xee0   :  { %2586 = vpow2.f32 %v1467_v27  ;;  %v1458_v20 = vsub.f32 %v1426_v60, %v1446_v12 }
 0xee1   :  { %v1469_v28 = vmul.f32 1.442695, %v1457_v31 }
 0xee2   :  { %v1471_v32 = vmul.f32 1.442695, %v1458_v20  ;;  %v1449_v35 = vpop.xlane.xlu0 %1448 }
 0xee3   :  { %2588 = vpow2.f32 %v1469_v28  ;;  %v1459_v38 = vsub.f32 %v1427_v11, %v1449_v35  ;;  %v1452_v40 = vpop.xlane.xlu1 %1451 }
 0xee4   :  { %2590 = vpow2.f32 %v1471_v32  ;;  %v1460_v41 = vsub.f32 %v1428_v16, %v1452_v40  ;;  %v2532_v40 = vld [vmem:[%s3206_s4 + $0x10] sm:$0xff]  }
 0xee5   :  { %v1473_v42 = vmul.f32 1.442695, %v1459_v38 }
 0xee6   :  { %v1475_v43 = vmul.f32 1.442695, %v1460_v41  ;;  %v1522_v44 = vpop.permute.xlu0 %1521 }
 0xee7   :  { %2592 = vpow2.f32 %v1473_v42  ;;  %2365 = vmatpush3.bf16.msra.mxu1 %v1522_v44  ;;  %v1569_v45 = vpop.permute.xlu1 %1568 }
 0xee8   :  { %2594 = vpow2.f32 %v1475_v43  ;;  %2371 = vmatpush3.bf16.msra.mxu0 %v1569_v45  ;;  %2376 = vmatprep.subr.bf16.mxu1 %v2621_v37  ;;  %v2533_v43 = vld [vmem:[%s3206_s4 + $0x18] sm:$0xff]  }
 0xee9   :  { %v2585_v51 = vpop.eup %2584  ;;  %2382 = vmatprep.subr.bf16.mxu0 %v2621_v37 }
 0xeea   :  { %v2587_v50 = vpop.eup %2586  ;;  %v1483_v54 = vsel %vm511_vm7, %v2585_v51, 0.0 }
 0xeeb   :  { %1484 = vadd.xlane.f32.xlu0 %v1483_v54  ;;  %v1486_v55 = vsel %vm511_vm7, %v2587_v50, 0.0 }
 0xeec   :  { %1487 = vadd.xlane.f32.xlu1 %v1486_v55 }
 0xeed   :  { %v2589_v56 = vpop.eup %2588 }
 0xeee   :  { %v2591_v57 = vpop.eup %2590  ;;  %v1489_v58 = vsel %vm511_vm7, %v2589_v56, 0.0 }
 0xeef   :  { %1490 = vadd.xlane.f32.xlu0 %v1489_v58  ;;  %v1492_v60 = vsel %vm511_vm7, %v2591_v57, 0.0 }
 0xef0   :  { %1493 = vadd.xlane.f32.xlu1 %v1492_v60 }
 0xef1   :  { %v2593_v61 = vpop.eup %2592 }
 0xef2   :  { %v2595_v62 = vpop.eup %2594  ;;  %v1495_v14 = vsel %vm511_vm7, %v2593_v61, 0.0 }
 0xef3   :  { %1496 = vadd.xlane.f32.xlu0 %v1495_v14  ;;  %v1498_v10 = vsel %vm511_vm7, %v2595_v62, 0.0 }
 0xef4   :  { %1499 = vadd.xlane.f32.xlu1 %v1498_v10 }
 0xf05   :  { %1615 = vrot.lane.b32.xlu1 %v3008_v7, %s2628_s0 }
 0xf09   :  { %1662 = vrot.lane.b32.xlu0 %v3016_v15, %s2628_s0 }
 0xf17   :  { %v1479_v1 = vpop.xlane.xlu0 %1478 }
 0xf18   :  { %2596 = vrcp.f32 %v1479_v1  ;;  %v1482_v4 = vpop.xlane.xlu1 %1481 }
 0xf19   :  { %2598 = vrcp.f32 %v1482_v4 }
 0xf22   :  { %v2597_v6 = vpop.eup %2596 }
 0xf23   :  { %v2599_v9 = vpop.eup %2598  ;;  %v1509_v11 = vmul.f32 %v2597_v6, %v2581_v30 }
 0xf24   :  { %v1510_v13 = vmul.f32 %v2599_v9, %v2583_v23 }
 0xf26   :  { %v1517_v16 = vpack.c.bf16 %v1510_v13, %v1509_v11 }
 0xf28   :  { %2367 = vmatmul.mubr.msk.bf16.vlgmr.msra.gmra.mrb[40].mxu1 %vm511_vm7, %v1517_v16 }
 0xf29   :  { %2378 = vmatprep.mubr.msk.bf16.mxu1 %vm2623_vm0, %v2621_v37 }
 0xf78   :  { %v1485_v17 = vpop.xlane.xlu0 %1484 }
 0xf79   :  { %2600 = vrcp.f32 %v1485_v17  ;;  %v1488_v7 = vpop.xlane.xlu1 %1487 }
 0xf7a   :  { %2602 = vrcp.f32 %v1488_v7 }
 0xf7c   :  { %v1491_v3 = vpop.xlane.xlu0 %1490 }
 0xf7d   :  { %2604 = vrcp.f32 %v1491_v3  ;;  %v1494_v15 = vpop.xlane.xlu1 %1493 }
 0xf7e   :  { %2606 = vrcp.f32 %v1494_v15 }
 0xf80   :  { %v1497_v18 = vpop.xlane.xlu0 %1496 }
 0xf81   :  { %2608 = vrcp.f32 %v1497_v18  ;;  %v1500_v19 = vpop.xlane.xlu1 %1499 }
 0xf82   :  { %2610 = vrcp.f32 %v1500_v19 }
 0xf83   :  { %v2601_v21 = vpop.eup %2600 }
 0xf84   :  { %v2603_v59 = vpop.eup %2602  ;;  %v1511_v22 = vmul.f32 %v2601_v21, %v2585_v51  ;;  %v1663_v2 = vpop.permute.xlu0 %1662 }
 0xf85   :  { %v1512_v30 = vmul.f32 %v2603_v59, %v2587_v50  ;;  %v1616_v23 = vpop.permute.xlu1 %1615 }
 0xf86   :  { %2377 = vmatpush3.bf16.msra.mxu1 %v1616_v23 }
 0xf87   :  { %v2605_v24 = vpop.eup %2604  ;;  %v1518_v25 = vpack.c.bf16 %v1512_v30, %v1511_v22  ;;  %2388 = vmatprep.subr.bf16.mxu1 %v2621_v37  ;;  %v1743_v22 = vrot.slane %v2997_v52, %v826_v63 }
 0xf88   :  { %v2607_v8 = vpop.eup %2606  ;;  %v1513_v48 = vmul.f32 %v2605_v24, %v2589_v56 }
 0xf89   :  { %v1514_v47 = vmul.f32 %v2607_v8, %v2591_v57  ;;  %2373 = vmatmul.mubr.msk.bf16.vlgmr.msra.gmra.mrb[32].mxu0 %vm511_vm7, %v1518_v25 }
 0xf8a   :  { %2383 = vmatpush3.bf16.msra.mxu0 %v1663_v2  ;;  %2384 = vmatprep.mubr.msk.bf16.mxu0 %vm2623_vm0, %v2621_v37 }
 0xf8b   :  { %v2609_v26 = vpop.eup %2608  ;;  %v1519_v27 = vpack.c.bf16 %v1514_v47, %v1513_v48  ;;  %2396 = vmatprep.subr.bf16.mxu0 %v2621_v37 }
 0xf8c   :  { %v2611_v29 = vpop.eup %2610  ;;  %v1515_v31 = vmul.f32 %v2609_v26, %v2593_v61 }
 0xf8d   :  { %v1516_v12 = vmul.f32 %v2611_v29, %v2595_v62  ;;  %2379 = vmatmul.mubr.msk.bf16.vlgmr.msra.gmra.mrb[44].mxu1 %vm511_vm7, %v1519_v27 }
 0xf8e   :  { %2392 = vmatprep.mubr.msk.bf16.mxu1 %vm2623_vm0, %v2621_v37  ;;  %2389 = vmatpush3.bf16.msra.mxu1 %v2532_v40  ;;  %v2535_v40 = vld [vmem:[%s3207_s5 + $0x18] sm:$0xff]  }
 0xf8f   :  { %v1520_v20 = vpack.c.bf16 %v1516_v12, %v1515_v31  ;;  %2390 = vmatprep.subr.bf16.mxu1 %v2621_v37 }
 0xf91   :  { %2385 = vmatmul.mubr.msk.bf16.vlgmr.msra.gmra.mrb[36].mxu0 %vm511_vm7, %v1520_v20 }
 0xf92   :  { %2400 = vmatprep.mubr.msk.bf16.mxu0 %vm2623_vm0, %v2621_v37  ;;  %2391 = vmatpush3.bf16.msra.mxu1 %v2533_v43 }
 0xf93   :  { %2404 = vmatprep.subr.bf16.mxu1 %v2621_v37 }
 0xffb   :  { %v1561_v28 = vpop.f32.mrb[40].mxu1 }
 0xffc   :  { %v2368_v32 = vpop.f32.mrb[41].mxu1 }
 0xffd   :  { %v1564_v35 = vpop.f32.mrb[42].mxu1 }
 0xffe   :  { %v2369_v38 = vpop.f32.mrb[43].mxu1 }
0x105c   :  { %v1608_v41 = vpop.f32.mrb[32].mxu0 }
0x105d   :  { %v2374_v42 = vpop.f32.mrb[33].mxu0 }
0x105e   :  { %v1611_v44 = vpop.f32.mrb[34].mxu0  ;;  %v2537_v42 = vld [vmem:[%s3208_s6 + $0x28] sm:$0xff]  }
0x105f   :  { %v2505_v45 = vpack.i.bf16 %v1611_v44, %v1608_v41  ;;  %v2375_v51 = vpop.f32.mrb[35].mxu0  ;;  %v2536_v41 = vld [vmem:[%s3208_s6 + $0x20] sm:$0xff]  }
0x1060   :  { %v1655_v50 = vpop.f32.mrb[44].mxu1 }
0x1061   :  { %2506 = vrot.lane.b32.xlu1 %v2505_v45, %s2629_s24  ;;  %v2380_v54 = vpop.f32.mrb[45].mxu1 }
0x1062   :  { %v1658_v55 = vpop.f32.mrb[46].mxu1 }
0x1063   :  { %v2510_v56 = vpack.i.bf16 %v1658_v55, %v1655_v50  ;;  %v2381_v57 = vpop.f32.mrb[47].mxu1 }
0x1064   :  { %v1702_v58 = vpop.f32.mrb[36].mxu0 }
0x1065   :  { %v2386_v60 = vpop.f32.mrb[37].mxu0  ;;  %2511 = vrot.lane.b32.xlu0 %v2510_v56, %s2630_s25  ;;  %v1831_v56 = vrot.slane %v2997_v52, %v915_v34  ;;  %v2538_v34 = vld [vmem:[%s3208_s6 + $0x30] sm:$0xff]  }
0x1066   :  { %v1705_v61 = vpop.f32.mrb[38].mxu0 }
0x1067   :  { %v2515_v62 = vpack.i.bf16 %v1705_v61, %v1702_v58  ;;  %v2387_v14 = vpop.f32.mrb[39].mxu0 }
0x1069   :  { %2516 = vrot.lane.b32.xlu1 %v2515_v62, %s2631_s26  ;;  %v1837_v62 = vrot.slane %v2997_v52, %v921_v39  ;;  %v2539_v39 = vld [vmem:[%s3208_s6 + $0x38] sm:$0xff]  }
0x10d3   :  { %v2507_v10 = vpop.permute.xlu1 %2506 }
0x10d4   :  { %v2509_v4 = vunpack.i.h.bf16 %v2507_v10  ;;  %v2508_v6 = vunpack.i.l.bf16 %v2507_v10 }
0x10d6   :  { %v1733_v16 = vsel %vm293_vm2, %v1561_v28, %v2508_v6  ;;  %v1734_v17 = vsel %vm293_vm2, %v1564_v35, %v2509_v4  ;;  %v1844_v6 = vrot.slane %v2997_v52, %v928_v53 }
0x10d7   :  { %v2512_v1 = vpop.permute.xlu0 %2511 }
0x10d8   :  { %v2514_v9 = vunpack.i.h.bf16 %v2512_v1  ;;  %v2513_v11 = vunpack.i.l.bf16 %v2512_v1 }
0x10da   :  { %v1736_v15 = vsel %vm511_vm7, %v1734_v17, %v2514_v9  ;;  %v1735_v18 = vsel %vm511_vm7, %v1733_v16, %v2513_v11 }
0x10db   :  { %v2517_v13 = vpop.permute.xlu1 %2516 }
0x10dc   :  { %v2519_v7 = vunpack.i.h.bf16 %v2517_v13  ;;  %v2518_v3 = vunpack.i.l.bf16 %v2517_v13 }
0x10de   :  { %v1737_v19 = vsel %vm820_vm4, %v1735_v18, %v2518_v3  ;;  %v1738_v21 = vsel %vm820_vm4, %v1736_v15, %v2519_v7 }
0x10df   :  { %v1739_v59 = vpack.c.bf16 %v1738_v21, %v1737_v19  ;;  %v1907_v19 = vrot.slane %v2997_v52, %v991_v0 }
0x10e1   :  { %2393 = vmatmul.mubr.msk.bf16.vlgmr.msra.gmra.mrb[48].mxu1 %vm221_vm1, %v1739_v59 }
0x10e2   :  { %2412 = vmatprep.mubr.msk.bf16.mxu1 %vm2623_vm0, %v2621_v37  ;;  %2405 = vmatpush3.bf16.msra.mxu1 %v2536_v41 }
0x10e3   :  { %2406 = vmatprep.subr.bf16.mxu1 %v2621_v37 }
0x10e6   :  { %2407 = vmatpush3.bf16.msra.mxu1 %v2537_v42 }
0x10e7   :  { %2408 = vmatprep.subr.bf16.mxu1 %v2621_v37 }
0x10ea   :  { %2409 = vmatpush3.bf16.msra.mxu1 %v2538_v34 }
0x10eb   :  { %2410 = vmatprep.subr.bf16.mxu1 %v2621_v37 }
0x10ee   :  { %2411 = vmatpush3.bf16.msra.mxu1 %v2539_v39 }
0x11b4   :  { %v1793_v30 = vpop.f32.mrb[48].mxu1 }
0x11b5   :  { %v1794_v23 = vadd.f32 %v1793_v30, %v1743_v22  ;;  %v2394_v24 = vpop.f32.mrb[49].mxu1 }
0x11b6   :  { %v1796_v25 = vpop.f32.mrb[50].mxu1 }
0x11b7   :  { %v1797_v8 = vadd.f32 %v1796_v25, %v1743_v22  ;;  %v2395_v48 = vpop.f32.mrb[51].mxu1  ;;  %v1800_v47 = vadd.f32 %v1794_v23, %v2985_v46 }
0x11b9   :  { %v1802_v2 = vsel %vm221_vm1, %v1800_v47, 0.0  ;;  %v1801_v26 = vadd.f32 %v1797_v8, %v2987_v49  ;;  %v2534_v49 = vld [vmem:[%s3207_s5 + $0x10] sm:$0xff]  }
0x11ba   :  { %1803 = vadd.xlane.f32.xlu0 %v1802_v2  ;;  %2397 = vmatpush3.bf16.msra.mxu0 %v2534_v49 }
0x11bb   :  { %v1805_v27 = vsel %vm221_vm1, %v1801_v26, 0.0  ;;  %2398 = vmatprep.subr.bf16.mxu0 %v2621_v37 }
0x11bc   :  { %1806 = vadd.xlane.f32.xlu1 %v1805_v27 }
0x11be   :  { %2399 = vmatpush3.bf16.msra.mxu0 %v2535_v40 }
0x11bf   :  { %2416 = vmatprep.subr.bf16.mxu0 %v2621_v37 }
0x1247   :  { %v1804_v29 = vpop.xlane.xlu0 %1803 }
0x1248   :  { %v1808_v31 = vmul.f32 0.03125, %v1804_v29 }
0x1249   :  { %v1807_v12 = vpop.xlane.xlu1 %1806 }
0x124a   :  { %v1810_v63 = vsub.f32 %v1800_v47, %v1808_v31  ;;  %v1809_v20 = vmul.f32 0.03125, %v1807_v12 }
0x124c   :  { %v1811_v28 = vsub.f32 %v1801_v26, %v1809_v20  ;;  %v1812_v32 = vmul.f32 %v1810_v63, %v1810_v63 }
0x124e   :  { %v1814_v35 = vsel %vm221_vm1, %v1812_v32, 0.0  ;;  %v1813_v38 = vmul.f32 %v1811_v28, %v1811_v28  ;;  %v2017_v32 = vld [vmem:[%s3209_s8 + $0x8] sm:$0xff] }
0x124f   :  { %1815 = vadd.xlane.f32.xlu0 %v1814_v35 }
0x1250   :  { %v1817_v46 = vsel %vm221_vm1, %v1813_v38, 0.0  ;;  %v2018_v38 = vld [vmem:[%s3209_s8 + $0x10] sm:$0xff] }
0x1253   :  { %1818 = vadd.xlane.f32.xlu0 %v1817_v46  ;;  %v2019_v46 = vld [vmem:[%s3209_s8 + $0x18] sm:$0xff] }
0x1254   :  { %v2021_v49 = vpack.c.bf16 %v2019_v46, %v2018_v38 }
0x12dc   :  { %v1816_v43 = vpop.xlane.xlu0 %1815 }
0x12dd   :  { %v1820_v44 = vmul.f32 0.03125, %v1816_v43 }
0x12df   :  { %v1822_v45 = vadd.f32 1e-06, %v1820_v44 }
0x12e0   :  { %v1819_v51 = vpop.xlane.xlu0 %1818 }
0x12e1   :  { %2612 = vrsqrt.f32 %v1822_v45  ;;  %v1821_v50 = vmul.f32 0.03125, %v1819_v51  ;;  %v2007_v51 = vrot.slane %v2997_v52, %v1092_v33 }
0x12e3   :  { %v1823_v54 = vadd.f32 1e-06, %v1821_v50 }
0x12e5   :  { %2614 = vrsqrt.f32 %v1823_v54 }
0x12eb   :  { %v2613_v55 = vpop.eup %2612 }
0x12ec   :  { %v1826_v57 = vmul.f32 %v2613_v55, %v1810_v63 }
0x12ee   :  { %v1832_v60 = vmul.f32 %v1831_v56, %v1826_v57 }
0x12ef   :  { %v2615_v58 = vpop.eup %2614 }
0x12f0   :  { %v1827_v61 = vmul.f32 %v2615_v58, %v1811_v28  ;;  %v1838_v10 = vadd.f32 %v1837_v62, %v1832_v60  ;;  %v2016_v28 = vld [vmem:[%s3209_s8] sm:$0xff] }
0x12f1   :  { %v2020_v35 = vpack.c.bf16 %v2017_v32, %v2016_v28 }
0x12f2   :  { %v1833_v14 = vmul.f32 %v1831_v56, %v1827_v61 }
0x12f4   :  { %v1839_v1 = vadd.f32 %v1837_v62, %v1833_v14  ;;  %v2148_v14 = vld [vmem:[%s3209_s8 + $0x20] ss:$0 sm:$0xff] }
0x12f6   :  { %v1840_v4 = vpack.c.bf16 %v1839_v1, %v1838_v10 }
0x12f8   :  { %2401 = vmatmul.mubr.msk.bf16.vlgmr.msra.gmra.mrb[40].mxu0 %vm221_vm1, %v1840_v4 }
0x12f9   :  { %2420 = vmatprep.mubr.msk.bf16.mxu0 %vm2623_vm0, %v2621_v37  ;;  %2417 = vmatpush3.bf16.msra.mxu0 %v2020_v35 }
0x12fa   :  { %2418 = vmatprep.subr.bf16.mxu0 %v2621_v37  ;;  %v2013_v37 = vrot.slane %v2997_v52, %v1098_v36 }
0x12fd   :  { %2419 = vmatpush3.bf16.msra.mxu0 %v2021_v49 }
0x13cb   :  { %v1894_v9 = vpop.f32.mrb[40].mxu0 }
0x13cc   :  { %v1895_v11 = vadd.f32 %v1894_v9, %v1844_v6  ;;  %v2402_v13 = vpop.f32.mrb[41].mxu0 }
0x13cd   :  { %v1897_v16 = vpop.f32.mrb[42].mxu0 }
0x13ce   :  { %v1898_v17 = vadd.f32 %v1897_v16, %v1844_v6  ;;  %v2403_v7 = vpop.f32.mrb[43].mxu0  ;;  %v1901_v3 = vmax.f32 %v1895_v11, 0.0 }
0x13d0   :  { %v1902_v15 = vmax.f32 %v1898_v17, 0.0 }
0x13d2   :  { %v1903_v18 = vpack.c.bf16 %v1902_v15, %v1901_v3 }
0x13d4   :  { %2413 = vmatmul.mubr.msk.bf16.vlgmr.msra.gmra.mrb[52].mxu1 %vm1017_vm8, %v1903_v18 }
0x14a7   :  { %v1969_v21 = vpop.f32.mrb[52].mxu1 }
0x14a8   :  { %v1970_v59 = vadd.f32 %v1969_v21, %v1907_v19  ;;  %v2414_v22 = vpop.f32.mrb[53].mxu1 }
0x14a9   :  { %v1972_v30 = vpop.f32.mrb[54].mxu1 }
0x14aa   :  { %v1973_v53 = vadd.f32 %v1972_v30, %v1907_v19  ;;  %v2415_v23 = vpop.f32.mrb[55].mxu1  ;;  %v1976_v24 = vadd.f32 %v1970_v59, %v1838_v10 }
0x14ac   :  { %v1978_v25 = vsel %vm221_vm1, %v1976_v24, 0.0  ;;  %v1977_v8 = vadd.f32 %v1973_v53, %v1839_v1 }
0x14ad   :  { %1979 = vadd.xlane.f32.xlu1 %v1978_v25 }
0x14ae   :  { %v1981_v48 = vsel %vm221_vm1, %v1977_v8, 0.0 }
0x14af   :  { %1982 = vadd.xlane.f32.xlu0 %v1981_v48 }
0x153a   :  { %v1980_v47 = vpop.xlane.xlu1 %1979 }
0x153b   :  { %v1984_v2 = vmul.f32 0.03125, %v1980_v47 }
0x153c   :  { %v1983_v26 = vpop.xlane.xlu0 %1982 }
0x153d   :  { %v1986_v27 = vsub.f32 %v1976_v24, %v1984_v2  ;;  %v1985_v29 = vmul.f32 0.03125, %v1983_v26 }
0x153f   :  { %v1987_v0 = vsub.f32 %v1977_v8, %v1985_v29  ;;  %v1988_v31 = vmul.f32 %v1986_v27, %v1986_v27 }
0x1541   :  { %v1990_v12 = vsel %vm221_vm1, %v1988_v31, 0.0  ;;  %v1989_v63 = vmul.f32 %v1987_v0, %v1987_v0 }
0x1542   :  { %1991 = vadd.xlane.f32.xlu1 %v1990_v12 }
0x1543   :  { %v1993_v20 = vsel %vm221_vm1, %v1989_v63, 0.0 }
0x1544   :  { %1994 = vadd.xlane.f32.xlu0 %v1993_v20 }
0x15cf   :  { %v1992_v40 = vpop.xlane.xlu1 %1991 }
0x15d0   :  { %v1996_v41 = vmul.f32 0.03125, %v1992_v40 }
0x15d1   :  { %v1995_v42 = vpop.xlane.xlu0 %1994 }
0x15d2   :  { %v1998_v43 = vadd.f32 1e-06, %v1996_v41  ;;  %v1997_v44 = vmul.f32 0.03125, %v1995_v42 }
0x15d4   :  { %2616 = vrsqrt.f32 %v1998_v43  ;;  %v1999_v45 = vadd.f32 1e-06, %v1997_v44 }
0x15d6   :  { %2618 = vrsqrt.f32 %v1999_v45 }
0x15de   :  { %v2617_v50 = vpop.eup %2616 }
0x15df   :  { %v2002_v54 = vmul.f32 %v2617_v50, %v1986_v27 }
0x15e0   :  { %v2619_v55 = vpop.eup %2618 }
0x15e1   :  { %v2008_v56 = vmul.f32 %v2007_v51, %v2002_v54  ;;  %v2003_v57 = vmul.f32 %v2619_v55, %v1987_v0 }
0x15e3   :  { %v2009_v58 = vmul.f32 %v2007_v51, %v2003_v57  ;;  %v2014_v60 = vadd.f32 %v2013_v37, %v2008_v56 }
0x15e5   :  { %v2015_v61 = vadd.f32 %v2013_v37, %v2009_v58 }
0x15e7   :  { %v2023_v62 = vpack.c.bf16 %v2015_v61, %v2014_v60 }
0x15e9   :  { %2421 = vmatmul.mubr.msk.bf16.vlgmr.msra.gmra.mrb[44].mxu0 %vm221_vm1, %v2023_v62 }
0x16bc   :  { %v2065_v33 = vpop.f32.mrb[44].mxu0 }
0x16bd   :  { %v2066_v10 = vadd.f32 %v2148_v14, %v2065_v33  ;;  %v2422_v1 = vpop.f32.mrb[45].mxu0 }
0x16be   :  { %v2068_v4 = vpop.f32.mrb[46].mxu0 }
0x16bf   :  { %2072 = vst [vmem:[%s3210_s9] sm:$0xff] %v2066_v10  ;;  %v2069_v5 = vadd.f32 %v2148_v14, %v2068_v4  ;;  %v2423_v36 = vpop.f32.mrb[47].mxu0 }
0x16c1   :  { %2073 = vst [vmem:[%s3210_s9 + $0x8] sm:$0xff] %v2069_v5 }

</bundles_post_ra>
